<compile_context>
chip_gen: v5e
topology: v5e:2x2
jax: 0.10.0
libtpu: 0.0.40
codegen_flags: <defaults>
</compile_context>

<pallas_src>
import functools

import jax
import jax.numpy as jnp
import numpy as np
from jax.experimental import pallas as pl
from jax.experimental.pallas import tpu as pltpu


def create_mapping_kernel(kernel_size=7):
    """Deterministic one-hot mapping kernel, identical to the PyTorch init.
    Only used by the pure-JAX reference — the Pallas kernel exploits the
    one-hot structure and never multiplies by it."""
    k = np.zeros((kernel_size * kernel_size, kernel_size, kernel_size), np.float32)
    for h in range(kernel_size):
        for w in range(kernel_size):
            k[h * kernel_size + w, h, w] = 1.0
    return jnp.asarray(k[:, None, :, :])  # (K*K, 1, K, K)


def _agg_kernel(thick_ref, thin_ref, coeff_ref, out_ref, *, K, W, p, tHW, pW):
    """Fused max + shifted multiply-accumulate on a (nB, tHW) lane-dense tile.

    thick_ref, thin_ref : (nB, HW + 2*pW)   flat, lane-padded saliency inputs
                          (resident for the whole batch block; constant over
                          the lane-tile grid axis)
    coeff_ref           : (nB, K*K, tHW)    aggregation coefficients tile
    out_ref             : (nB, tHW)         output tile
    """
    nB = out_ref.shape[0]
    L = tHW + 2 * pW                       # saliency window covering all taps
    r = pl.program_id(1)
    start = pl.multiple_of(r * tHW, 128)   # global flat offset of this tile
                                           # (tHW % 128 == 0 whenever r can be > 0)

    # Fused elementwise max of the two padded saliency maps (VPU).
    win = jnp.maximum(thick_ref[:, pl.ds(start, L)],
                      thin_ref[:, pl.ds(start, L)]).astype(jnp.float32)

    # Column-validity masks, one per horizontal offset dx, hoisted out of the
    # K*K tap loop.  A tap at dx must be zero (conv zero padding) when the
    # source column x + dx falls outside [0, W).
    lane = jax.lax.broadcasted_iota(jnp.int32, (nB, tHW), 1)
    col = (lane + start) % W
    col_masks = [((col + dx) >= 0) & ((col + dx) < W) for dx in range(-p, p + 1)]

    # Shifted-window MAC == conv with one-hot kernels + channel reduction
    # against agg_coeff.  Vertical shifts are multiples of W on the flat lane
    # axis; out-of-image rows read the zero padding, out-of-image columns are
    # killed by the hoisted masks.
    acc = None
    for dy in range(-p, p + 1):
        row_off = pW + dy * W
        for dx in range(-p, p + 1):
            off = row_off + dx                               # static, in [0, 2*pW]
            tap = win[:, off:off + tHW]                      # (nB, tHW)
            tap = jnp.where(col_masks[dx + p], tap, 0.0)
            ch = (dy + p) * K + (dx + p)
            term = tap * coeff_ref[:, ch, :].astype(jnp.float32)
            acc = term if acc is None else acc + term        # init from 1st tap
    out_ref[...] = acc.astype(out_ref.dtype)


def adaptive_aggregation(input_thick, input_thin, agg_coeff, pn_size=5):
    N, C, H, W = input_thick.shape
    assert C == 1 and input_thin.shape == input_thick.shape
    K = pn_size
    p = K // 2
    KK = K * K
    assert agg_coeff.shape == (N, KK, H, W)

    HW = H * W
    pW = p * W + p                 # max |flat shift| = p rows + p columns
    HWpad = HW + 2 * pW
    itemsize = jnp.dtype(agg_coeff.dtype).itemsize
    budget = 4 * 1024 * 1024       # target coeff bytes moved per grid step

    # ---- batch blocking (review: one tiny image per step starves the DMA) ----
    coeff_img_bytes = KK * HW * itemsize
    if N <= 8 or N * coeff_img_bytes <= budget:
        nB = N                                             # full-extent block
    else:
        nB = max(8, min(N, budget // coeff_img_bytes) // 8 * 8)
    Npad = -(-N // nB) * nB

    # ---- lane tiling of the flattened spatial axis for large maps ----
    tHW = HW
    if nB * KK * HW * itemsize > budget and HW % 128 == 0:
        t = min(HW, max(128, (budget // (nB * KK * itemsize)) // 128 * 128))
        while t > 128 and HW % t != 0:
            t -= 128
        if HW % t == 0:
            tHW = t
    # TODO(synk): huge maps with H*W not a multiple of 128 keep a single
    # full-extent lane block; pad H*W up to a 128 multiple to tile those too.

    # ---- wrapper layout plumbing (lane-dense slabs, flat zero padding) ----
    thick_p = jnp.pad(input_thick.reshape(N, HW), ((0, Npad - N), (pW, pW)))
    thin_p = jnp.pad(input_thin.reshape(N, HW), ((0, Npad - N), (pW, pW)))
    coeff_f = agg_coeff.reshape(N, KK, HW)
    if Npad != N:
        coeff_f = jnp.pad(coeff_f, ((0, Npad - N), (0, 0), (0, 0)))

    grid = (Npad // nB, HW // tHW)
    kernel = functools.partial(_agg_kernel, K=K, W=W, p=p, tHW=tHW, pW=pW)

    # Double-buffered block footprint -> explicit (generation-safe) VMEM limit.
    vmem_need = (2 * nB * KK * tHW + 4 * nB * HWpad + 2 * nB * tHW) * itemsize
    vmem_limit = int(min(48 * 1024 * 1024, max(32 * 1024 * 1024, 2 * vmem_need)))

    out = pl.pallas_call(
        kernel,
        out_shape=jax.ShapeDtypeStruct((Npad, HW), input_thick.dtype),
        grid_spec=pltpu.PrefetchScalarGridSpec(
            num_scalar_prefetch=0,
            grid=grid,
            in_specs=[
                # padded saliency maps: resident per batch block (constant
                # over the lane-tile axis), sliced with pl.ds in the kernel
                pl.BlockSpec((nB, HWpad), lambda b, r: (b, 0)),
                pl.BlockSpec((nB, HWpad), lambda b, r: (b, 0)),
                # dominant stream: lane-dense coeff tile
                pl.BlockSpec((nB, KK, tHW), lambda b, r: (b, 0, r)),
            ],
            out_specs=pl.BlockSpec((nB, tHW), lambda b, r: (b, r)),
        ),
        compiler_params=pltpu.CompilerParams(
            dimension_semantics=("parallel", "arbitrary"),
            vmem_limit_bytes=vmem_limit,
        ),
    )(thick_p, thin_p, coeff_f)

    return out[:N].reshape(N, 1, H, W)


def adaptive_aggregation_ref(input_thick, input_thin, agg_coeff, pn_size=5):
    """Pure-JAX reference that mirrors the PyTorch module exactly."""
    K = pn_size
    weight = create_mapping_kernel(K)  # (K*K, 1, K, K)
    input_sal = jnp.maximum(input_thick, input_thin)
    map_sal = jax.lax.conv_general_dilated(
        input_sal, weight,
        window_strides=(1, 1),
        padding=[(K // 2, K // 2), (K // 2, K // 2)],
        dimension_numbers=("NCHW", "OIHW", "NCHW"))
    prod_sal = jnp.sum(map_sal * agg_coeff, axis=1, keepdims=True)
    return prod_sal


if __name__ == "__main__":
    N, H, W = 2, 16, 16
    pn_size = 5
    KK = pn_size * pn_size

    key = jax.random.PRNGKey(0)
    k1, k2, k3 = jax.random.split(key, 3)
    input_thick = jax.random.normal(k1, (N, 1, H, W), dtype=jnp.float32)
    input_thin = jax.random.normal(k2, (N, 1, H, W), dtype=jnp.float32)
    agg_coeff = jax.random.normal(k3, (N, KK, H, W), dtype=jnp.float32)

    out = adaptive_aggregation(input_thick, input_thin, agg_coeff, pn_size)
    out = jax.block_until_ready(out)

    ref = adaptive_aggregation_ref(input_thick, input_thin, agg_coeff, pn_size)
    ref = jax.block_until_ready(ref)

    assert out.shape == (N, 1, H, W), out.shape
    np.testing.assert_allclose(np.asarray(out), np.asarray(ref),
                               rtol=1e-5, atol=1e-5)
    print("KERNEL_OK")
</pallas_src>

<mosaic_0001>
module attributes {stable_mosaic.version = 11 : i64} {
  func.func @_agg_kernel(%arg0: i32, %arg1: i32, %arg2: memref<2x324xf32, #tpu.memory_space<vmem>>, %arg3: memref<2x324xf32, #tpu.memory_space<vmem>>, %arg4: memref<2x25x256xf32, #tpu.memory_space<vmem>>, %arg5: memref<2x256xf32, #tpu.memory_space<vmem>>) attributes {dimension_semantics = [#tpu.dimension_semantics<parallel>, #tpu.dimension_semantics<arbitrary>], iteration_bounds = array<i64: 1, 1>, scalar_prefetch = 0 : i64, scratch_operands = 0 : i64, tpu.core_type = #tpu.core_type<tc>, window_params = [{transform_indices = @transform_0, window_bounds = array<i64: 2, 324>}, {transform_indices = @transform_1, window_bounds = array<i64: 2, 324>}, {transform_indices = @transform_2, window_bounds = array<i64: 2, 25, 256>}, {transform_indices = @transform_3, window_bounds = array<i64: 2, 256>}]} {
    %c256_i32 = arith.constant 256 : i32
    %0 = arith.muli %arg1, %c256_i32 : i32
    %1 = tpu.assume_multiple %0, 128 : i32
    %c0 = arith.constant 0 : index
    %2 = arith.index_cast %1 : i32 to index
    %3 = vector.load %arg2[%c0, %2] : memref<2x324xf32, #tpu.memory_space<vmem>>, vector<2x324xf32>
    %c0_0 = arith.constant 0 : index
    %4 = arith.index_cast %1 : i32 to index
    %5 = vector.load %arg3[%c0_0, %4] : memref<2x324xf32, #tpu.memory_space<vmem>>, vector<2x324xf32>
    %6 = arith.maximumf %3, %5 : vector<2x324xf32>
    %7 = tpu.iota {dimensions = array<i32: 1>} : vector<2x256xi32>
    %8 = vector.broadcast %1 : i32 to vector<2x256xi32>
    %9 = arith.addi %7, %8 : vector<2x256xi32>
    %c16_i32 = arith.constant 16 : i32
    %c0_i32 = arith.constant 0 : i32
    %10 = arith.cmpi eq, %c16_i32, %c0_i32 : i32
    %c1_i32 = arith.constant 1 : i32
    %11 = arith.select %10, %c1_i32, %c16_i32 : i32
    %12 = vector.broadcast %11 : i32 to vector<2x256xi32>
    %13 = arith.remsi %9, %12 : vector<2x256xi32>
    %c0_i32_1 = arith.constant 0 : i32
    %14 = vector.broadcast %c0_i32_1 : i32 to vector<2x256xi32>
    %15 = arith.cmpi ne, %13, %14 : vector<2x256xi32>
    %c0_i32_2 = arith.constant 0 : i32
    %16 = vector.broadcast %c0_i32_2 : i32 to vector<2x256xi32>
    %17 = arith.cmpi slt, %13, %16 : vector<2x256xi32>
    %c0_i32_3 = arith.constant 0 : i32
    %18 = arith.cmpi slt, %11, %c0_i32_3 : i32
    %19 = vector.broadcast %18 : i1 to vector<2x256xi1>
    %20 = vector.broadcast %19 : vector<2x256xi1> to vector<2x256xi1>
    %21 = arith.xori %17, %20 : vector<2x256xi1>
    %22 = arith.andi %21, %15 : vector<2x256xi1>
    %23 = vector.broadcast %11 : i32 to vector<2x256xi32>
    %24 = arith.addi %13, %23 : vector<2x256xi32>
    %25 = arith.select %22, %24, %13 : vector<2x256xi1>, vector<2x256xi32>
    %c-2_i32 = arith.constant -2 : i32
    %26 = vector.broadcast %c-2_i32 : i32 to vector<2x256xi32>
    %27 = arith.addi %25, %26 : vector<2x256xi32>
    %c0_i32_4 = arith.constant 0 : i32
    %28 = vector.broadcast %c0_i32_4 : i32 to vector<2x256xi32>
    %29 = arith.cmpi sge, %27, %28 : vector<2x256xi32>
    %c-2_i32_5 = arith.constant -2 : i32
    %30 = vector.broadcast %c-2_i32_5 : i32 to vector<2x256xi32>
    %31 = arith.addi %25, %30 : vector<2x256xi32>
    %c16_i32_6 = arith.constant 16 : i32
    %32 = vector.broadcast %c16_i32_6 : i32 to vector<2x256xi32>
    %33 = arith.cmpi slt, %31, %32 : vector<2x256xi32>
    %34 = arith.andi %29, %33 : vector<2x256xi1>
    %c-1_i32 = arith.constant -1 : i32
    %35 = vector.broadcast %c-1_i32 : i32 to vector<2x256xi32>
    %36 = arith.addi %25, %35 : vector<2x256xi32>
    %c0_i32_7 = arith.constant 0 : i32
    %37 = vector.broadcast %c0_i32_7 : i32 to vector<2x256xi32>
    %38 = arith.cmpi sge, %36, %37 : vector<2x256xi32>
    %c-1_i32_8 = arith.constant -1 : i32
    %39 = vector.broadcast %c-1_i32_8 : i32 to vector<2x256xi32>
    %40 = arith.addi %25, %39 : vector<2x256xi32>
    %c16_i32_9 = arith.constant 16 : i32
    %41 = vector.broadcast %c16_i32_9 : i32 to vector<2x256xi32>
    %42 = arith.cmpi slt, %40, %41 : vector<2x256xi32>
    %43 = arith.andi %38, %42 : vector<2x256xi1>
    %c0_i32_10 = arith.constant 0 : i32
    %44 = vector.broadcast %c0_i32_10 : i32 to vector<2x256xi32>
    %45 = arith.addi %25, %44 : vector<2x256xi32>
    %c0_i32_11 = arith.constant 0 : i32
    %46 = vector.broadcast %c0_i32_11 : i32 to vector<2x256xi32>
    %47 = arith.cmpi sge, %45, %46 : vector<2x256xi32>
    %c0_i32_12 = arith.constant 0 : i32
    %48 = vector.broadcast %c0_i32_12 : i32 to vector<2x256xi32>
    %49 = arith.addi %25, %48 : vector<2x256xi32>
    %c16_i32_13 = arith.constant 16 : i32
    %50 = vector.broadcast %c16_i32_13 : i32 to vector<2x256xi32>
    %51 = arith.cmpi slt, %49, %50 : vector<2x256xi32>
    %52 = arith.andi %47, %51 : vector<2x256xi1>
    %c1_i32_14 = arith.constant 1 : i32
    %53 = vector.broadcast %c1_i32_14 : i32 to vector<2x256xi32>
    %54 = arith.addi %25, %53 : vector<2x256xi32>
    %c0_i32_15 = arith.constant 0 : i32
    %55 = vector.broadcast %c0_i32_15 : i32 to vector<2x256xi32>
    %56 = arith.cmpi sge, %54, %55 : vector<2x256xi32>
    %c1_i32_16 = arith.constant 1 : i32
    %57 = vector.broadcast %c1_i32_16 : i32 to vector<2x256xi32>
    %58 = arith.addi %25, %57 : vector<2x256xi32>
    %c16_i32_17 = arith.constant 16 : i32
    %59 = vector.broadcast %c16_i32_17 : i32 to vector<2x256xi32>
    %60 = arith.cmpi slt, %58, %59 : vector<2x256xi32>
    %61 = arith.andi %56, %60 : vector<2x256xi1>
    %c2_i32 = arith.constant 2 : i32
    %62 = vector.broadcast %c2_i32 : i32 to vector<2x256xi32>
    %63 = arith.addi %25, %62 : vector<2x256xi32>
    %c0_i32_18 = arith.constant 0 : i32
    %64 = vector.broadcast %c0_i32_18 : i32 to vector<2x256xi32>
    %65 = arith.cmpi sge, %63, %64 : vector<2x256xi32>
    %c2_i32_19 = arith.constant 2 : i32
    %66 = vector.broadcast %c2_i32_19 : i32 to vector<2x256xi32>
    %67 = arith.addi %25, %66 : vector<2x256xi32>
    %c16_i32_20 = arith.constant 16 : i32
    %68 = vector.broadcast %c16_i32_20 : i32 to vector<2x256xi32>
    %69 = arith.cmpi slt, %67, %68 : vector<2x256xi32>
    %70 = arith.andi %65, %69 : vector<2x256xi1>
    %71 = vector.extract_strided_slice %6 {offsets = [0, 0], sizes = [2, 256], strides = [1, 1]} : vector<2x324xf32> to vector<2x256xf32>
    %cst = arith.constant 0.000000e+00 : f32
    %72 = vector.broadcast %cst : f32 to vector<2x256xf32>
    %73 = arith.select %34, %71, %72 : vector<2x256xi1>, vector<2x256xf32>
    %c0_21 = arith.constant 0 : index
    %c0_22 = arith.constant 0 : index
    %c0_23 = arith.constant 0 : index
    %74 = vector.load %arg4[%c0_21, %c0_22, %c0_23] : memref<2x25x256xf32, #tpu.memory_space<vmem>>, vector<2x1x256xf32>
    %75 = vector.shape_cast %74 : vector<2x1x256xf32> to vector<2x256xf32>
    %76 = arith.mulf %73, %75 : vector<2x256xf32>
    %77 = vector.extract_strided_slice %6 {offsets = [0, 1], sizes = [2, 256], strides = [1, 1]} : vector<2x324xf32> to vector<2x256xf32>
    %cst_24 = arith.constant 0.000000e+00 : f32
    %78 = vector.broadcast %cst_24 : f32 to vector<2x256xf32>
    %79 = arith.select %43, %77, %78 : vector<2x256xi1>, vector<2x256xf32>
    %c0_25 = arith.constant 0 : index
    %c1 = arith.constant 1 : index
    %c0_26 = arith.constant 0 : index
    %80 = vector.load %arg4[%c0_25, %c1, %c0_26] : memref<2x25x256xf32, #tpu.memory_space<vmem>>, vector<2x1x256xf32>
    %81 = vector.shape_cast %80 : vector<2x1x256xf32> to vector<2x256xf32>
    %82 = arith.mulf %79, %81 : vector<2x256xf32>
    %83 = arith.addf %76, %82 : vector<2x256xf32>
    %84 = vector.extract_strided_slice %6 {offsets = [0, 2], sizes = [2, 256], strides = [1, 1]} : vector<2x324xf32> to vector<2x256xf32>
    %cst_27 = arith.constant 0.000000e+00 : f32
    %85 = vector.broadcast %cst_27 : f32 to vector<2x256xf32>
    %86 = arith.select %52, %84, %85 : vector<2x256xi1>, vector<2x256xf32>
    %c0_28 = arith.constant 0 : index
    %c2 = arith.constant 2 : index
    %c0_29 = arith.constant 0 : index
    %87 = vector.load %arg4[%c0_28, %c2, %c0_29] : memref<2x25x256xf32, #tpu.memory_space<vmem>>, vector<2x1x256xf32>
    %88 = vector.shape_cast %87 : vector<2x1x256xf32> to vector<2x256xf32>
    %89 = arith.mulf %86, %88 : vector<2x256xf32>
    %90 = arith.addf %83, %89 : vector<2x256xf32>
    %91 = vector.extract_strided_slice %6 {offsets = [0, 3], sizes = [2, 256], strides = [1, 1]} : vector<2x324xf32> to vector<2x256xf32>
    %cst_30 = arith.constant 0.000000e+00 : f32
    %92 = vector.broadcast %cst_30 : f32 to vector<2x256xf32>
    %93 = arith.select %61, %91, %92 : vector<2x256xi1>, vector<2x256xf32>
    %c0_31 = arith.constant 0 : index
    %c3 = arith.constant 3 : index
    %c0_32 = arith.constant 0 : index
    %94 = vector.load %arg4[%c0_31, %c3, %c0_32] : memref<2x25x256xf32, #tpu.memory_space<vmem>>, vector<2x1x256xf32>
    %95 = vector.shape_cast %94 : vector<2x1x256xf32> to vector<2x256xf32>
    %96 = arith.mulf %93, %95 : vector<2x256xf32>
    %97 = arith.addf %90, %96 : vector<2x256xf32>
    %98 = vector.extract_strided_slice %6 {offsets = [0, 4], sizes = [2, 256], strides = [1, 1]} : vector<2x324xf32> to vector<2x256xf32>
    %cst_33 = arith.constant 0.000000e+00 : f32
    %99 = vector.broadcast %cst_33 : f32 to vector<2x256xf32>
    %100 = arith.select %70, %98, %99 : vector<2x256xi1>, vector<2x256xf32>
    %c0_34 = arith.constant 0 : index
    %c4 = arith.constant 4 : index
    %c0_35 = arith.constant 0 : index
    %101 = vector.load %arg4[%c0_34, %c4, %c0_35] : memref<2x25x256xf32, #tpu.memory_space<vmem>>, vector<2x1x256xf32>
    %102 = vector.shape_cast %101 : vector<2x1x256xf32> to vector<2x256xf32>
    %103 = arith.mulf %100, %102 : vector<2x256xf32>
    %104 = arith.addf %97, %103 : vector<2x256xf32>
    %105 = vector.extract_strided_slice %6 {offsets = [0, 16], sizes = [2, 256], strides = [1, 1]} : vector<2x324xf32> to vector<2x256xf32>
    %cst_36 = arith.constant 0.000000e+00 : f32
    %106 = vector.broadcast %cst_36 : f32 to vector<2x256xf32>
    %107 = arith.select %34, %105, %106 : vector<2x256xi1>, vector<2x256xf32>
    %c0_37 = arith.constant 0 : index
    %c5 = arith.constant 5 : index
    %c0_38 = arith.constant 0 : index
    %108 = vector.load %arg4[%c0_37, %c5, %c0_38] : memref<2x25x256xf32, #tpu.memory_space<vmem>>, vector<2x1x256xf32>
    %109 = vector.shape_cast %108 : vector<2x1x256xf32> to vector<2x256xf32>
    %110 = arith.mulf %107, %109 : vector<2x256xf32>
    %111 = arith.addf %104, %110 : vector<2x256xf32>
    %112 = vector.extract_strided_slice %6 {offsets = [0, 17], sizes = [2, 256], strides = [1, 1]} : vector<2x324xf32> to vector<2x256xf32>
    %cst_39 = arith.constant 0.000000e+00 : f32
    %113 = vector.broadcast %cst_39 : f32 to vector<2x256xf32>
    %114 = arith.select %43, %112, %113 : vector<2x256xi1>, vector<2x256xf32>
    %c0_40 = arith.constant 0 : index
    %c6 = arith.constant 6 : index
    %c0_41 = arith.constant 0 : index
    %115 = vector.load %arg4[%c0_40, %c6, %c0_41] : memref<2x25x256xf32, #tpu.memory_space<vmem>>, vector<2x1x256xf32>
    %116 = vector.shape_cast %115 : vector<2x1x256xf32> to vector<2x256xf32>
    %117 = arith.mulf %114, %116 : vector<2x256xf32>
    %118 = arith.addf %111, %117 : vector<2x256xf32>
    %119 = vector.extract_strided_slice %6 {offsets = [0, 18], sizes = [2, 256], strides = [1, 1]} : vector<2x324xf32> to vector<2x256xf32>
    %cst_42 = arith.constant 0.000000e+00 : f32
    %120 = vector.broadcast %cst_42 : f32 to vector<2x256xf32>
    %121 = arith.select %52, %119, %120 : vector<2x256xi1>, vector<2x256xf32>
    %c0_43 = arith.constant 0 : index
    %c7 = arith.constant 7 : index
    %c0_44 = arith.constant 0 : index
    %122 = vector.load %arg4[%c0_43, %c7, %c0_44] : memref<2x25x256xf32, #tpu.memory_space<vmem>>, vector<2x1x256xf32>
    %123 = vector.shape_cast %122 : vector<2x1x256xf32> to vector<2x256xf32>
    %124 = arith.mulf %121, %123 : vector<2x256xf32>
    %125 = arith.addf %118, %124 : vector<2x256xf32>
    %126 = vector.extract_strided_slice %6 {offsets = [0, 19], sizes = [2, 256], strides = [1, 1]} : vector<2x324xf32> to vector<2x256xf32>
    %cst_45 = arith.constant 0.000000e+00 : f32
    %127 = vector.broadcast %cst_45 : f32 to vector<2x256xf32>
    %128 = arith.select %61, %126, %127 : vector<2x256xi1>, vector<2x256xf32>
    %c0_46 = arith.constant 0 : index
    %c8 = arith.constant 8 : index
    %c0_47 = arith.constant 0 : index
    %129 = vector.load %arg4[%c0_46, %c8, %c0_47] : memref<2x25x256xf32, #tpu.memory_space<vmem>>, vector<2x1x256xf32>
    %130 = vector.shape_cast %129 : vector<2x1x256xf32> to vector<2x256xf32>
    %131 = arith.mulf %128, %130 : vector<2x256xf32>
    %132 = arith.addf %125, %131 : vector<2x256xf32>
    %133 = vector.extract_strided_slice %6 {offsets = [0, 20], sizes = [2, 256], strides = [1, 1]} : vector<2x324xf32> to vector<2x256xf32>
    %cst_48 = arith.constant 0.000000e+00 : f32
    %134 = vector.broadcast %cst_48 : f32 to vector<2x256xf32>
    %135 = arith.select %70, %133, %134 : vector<2x256xi1>, vector<2x256xf32>
    %c0_49 = arith.constant 0 : index
    %c9 = arith.constant 9 : index
    %c0_50 = arith.constant 0 : index
    %136 = vector.load %arg4[%c0_49, %c9, %c0_50] : memref<2x25x256xf32, #tpu.memory_space<vmem>>, vector<2x1x256xf32>
    %137 = vector.shape_cast %136 : vector<2x1x256xf32> to vector<2x256xf32>
    %138 = arith.mulf %135, %137 : vector<2x256xf32>
    %139 = arith.addf %132, %138 : vector<2x256xf32>
    %140 = vector.extract_strided_slice %6 {offsets = [0, 32], sizes = [2, 256], strides = [1, 1]} : vector<2x324xf32> to vector<2x256xf32>
    %cst_51 = arith.constant 0.000000e+00 : f32
    %141 = vector.broadcast %cst_51 : f32 to vector<2x256xf32>
    %142 = arith.select %34, %140, %141 : vector<2x256xi1>, vector<2x256xf32>
    %c0_52 = arith.constant 0 : index
    %c10 = arith.constant 10 : index
    %c0_53 = arith.constant 0 : index
    %143 = vector.load %arg4[%c0_52, %c10, %c0_53] : memref<2x25x256xf32, #tpu.memory_space<vmem>>, vector<2x1x256xf32>
    %144 = vector.shape_cast %143 : vector<2x1x256xf32> to vector<2x256xf32>
    %145 = arith.mulf %142, %144 : vector<2x256xf32>
    %146 = arith.addf %139, %145 : vector<2x256xf32>
    %147 = vector.extract_strided_slice %6 {offsets = [0, 33], sizes = [2, 256], strides = [1, 1]} : vector<2x324xf32> to vector<2x256xf32>
    %cst_54 = arith.constant 0.000000e+00 : f32
    %148 = vector.broadcast %cst_54 : f32 to vector<2x256xf32>
    %149 = arith.select %43, %147, %148 : vector<2x256xi1>, vector<2x256xf32>
    %c0_55 = arith.constant 0 : index
    %c11 = arith.constant 11 : index
    %c0_56 = arith.constant 0 : index
    %150 = vector.load %arg4[%c0_55, %c11, %c0_56] : memref<2x25x256xf32, #tpu.memory_space<vmem>>, vector<2x1x256xf32>
    %151 = vector.shape_cast %150 : vector<2x1x256xf32> to vector<2x256xf32>
    %152 = arith.mulf %149, %151 : vector<2x256xf32>
    %153 = arith.addf %146, %152 : vector<2x256xf32>
    %154 = vector.extract_strided_slice %6 {offsets = [0, 34], sizes = [2, 256], strides = [1, 1]} : vector<2x324xf32> to vector<2x256xf32>
    %cst_57 = arith.constant 0.000000e+00 : f32
    %155 = vector.broadcast %cst_57 : f32 to vector<2x256xf32>
    %156 = arith.select %52, %154, %155 : vector<2x256xi1>, vector<2x256xf32>
    %c0_58 = arith.constant 0 : index
    %c12 = arith.constant 12 : index
    %c0_59 = arith.constant 0 : index
    %157 = vector.load %arg4[%c0_58, %c12, %c0_59] : memref<2x25x256xf32, #tpu.memory_space<vmem>>, vector<2x1x256xf32>
    %158 = vector.shape_cast %157 : vector<2x1x256xf32> to vector<2x256xf32>
    %159 = arith.mulf %156, %158 : vector<2x256xf32>
    %160 = arith.addf %153, %159 : vector<2x256xf32>
    %161 = vector.extract_strided_slice %6 {offsets = [0, 35], sizes = [2, 256], strides = [1, 1]} : vector<2x324xf32> to vector<2x256xf32>
    %cst_60 = arith.constant 0.000000e+00 : f32
    %162 = vector.broadcast %cst_60 : f32 to vector<2x256xf32>
    %163 = arith.select %61, %161, %162 : vector<2x256xi1>, vector<2x256xf32>
    %c0_61 = arith.constant 0 : index
    %c13 = arith.constant 13 : index
    %c0_62 = arith.constant 0 : index
    %164 = vector.load %arg4[%c0_61, %c13, %c0_62] : memref<2x25x256xf32, #tpu.memory_space<vmem>>, vector<2x1x256xf32>
    %165 = vector.shape_cast %164 : vector<2x1x256xf32> to vector<2x256xf32>
    %166 = arith.mulf %163, %165 : vector<2x256xf32>
    %167 = arith.addf %160, %166 : vector<2x256xf32>
    %168 = vector.extract_strided_slice %6 {offsets = [0, 36], sizes = [2, 256], strides = [1, 1]} : vector<2x324xf32> to vector<2x256xf32>
    %cst_63 = arith.constant 0.000000e+00 : f32
    %169 = vector.broadcast %cst_63 : f32 to vector<2x256xf32>
    %170 = arith.select %70, %168, %169 : vector<2x256xi1>, vector<2x256xf32>
    %c0_64 = arith.constant 0 : index
    %c14 = arith.constant 14 : index
    %c0_65 = arith.constant 0 : index
    %171 = vector.load %arg4[%c0_64, %c14, %c0_65] : memref<2x25x256xf32, #tpu.memory_space<vmem>>, vector<2x1x256xf32>
    %172 = vector.shape_cast %171 : vector<2x1x256xf32> to vector<2x256xf32>
    %173 = arith.mulf %170, %172 : vector<2x256xf32>
    %174 = arith.addf %167, %173 : vector<2x256xf32>
    %175 = vector.extract_strided_slice %6 {offsets = [0, 48], sizes = [2, 256], strides = [1, 1]} : vector<2x324xf32> to vector<2x256xf32>
    %cst_66 = arith.constant 0.000000e+00 : f32
    %176 = vector.broadcast %cst_66 : f32 to vector<2x256xf32>
    %177 = arith.select %34, %175, %176 : vector<2x256xi1>, vector<2x256xf32>
    %c0_67 = arith.constant 0 : index
    %c15 = arith.constant 15 : index
    %c0_68 = arith.constant 0 : index
    %178 = vector.load %arg4[%c0_67, %c15, %c0_68] : memref<2x25x256xf32, #tpu.memory_space<vmem>>, vector<2x1x256xf32>
    %179 = vector.shape_cast %178 : vector<2x1x256xf32> to vector<2x256xf32>
    %180 = arith.mulf %177, %179 : vector<2x256xf32>
    %181 = arith.addf %174, %180 : vector<2x256xf32>
    %182 = vector.extract_strided_slice %6 {offsets = [0, 49], sizes = [2, 256], strides = [1, 1]} : vector<2x324xf32> to vector<2x256xf32>
    %cst_69 = arith.constant 0.000000e+00 : f32
    %183 = vector.broadcast %cst_69 : f32 to vector<2x256xf32>
    %184 = arith.select %43, %182, %183 : vector<2x256xi1>, vector<2x256xf32>
    %c0_70 = arith.constant 0 : index
    %c16 = arith.constant 16 : index
    %c0_71 = arith.constant 0 : index
    %185 = vector.load %arg4[%c0_70, %c16, %c0_71] : memref<2x25x256xf32, #tpu.memory_space<vmem>>, vector<2x1x256xf32>
    %186 = vector.shape_cast %185 : vector<2x1x256xf32> to vector<2x256xf32>
    %187 = arith.mulf %184, %186 : vector<2x256xf32>
    %188 = arith.addf %181, %187 : vector<2x256xf32>
    %189 = vector.extract_strided_slice %6 {offsets = [0, 50], sizes = [2, 256], strides = [1, 1]} : vector<2x324xf32> to vector<2x256xf32>
    %cst_72 = arith.constant 0.000000e+00 : f32
    %190 = vector.broadcast %cst_72 : f32 to vector<2x256xf32>
    %191 = arith.select %52, %189, %190 : vector<2x256xi1>, vector<2x256xf32>
    %c0_73 = arith.constant 0 : index
    %c17 = arith.constant 17 : index
    %c0_74 = arith.constant 0 : index
    %192 = vector.load %arg4[%c0_73, %c17, %c0_74] : memref<2x25x256xf32, #tpu.memory_space<vmem>>, vector<2x1x256xf32>
    %193 = vector.shape_cast %192 : vector<2x1x256xf32> to vector<2x256xf32>
    %194 = arith.mulf %191, %193 : vector<2x256xf32>
    %195 = arith.addf %188, %194 : vector<2x256xf32>
    %196 = vector.extract_strided_slice %6 {offsets = [0, 51], sizes = [2, 256], strides = [1, 1]} : vector<2x324xf32> to vector<2x256xf32>
    %cst_75 = arith.constant 0.000000e+00 : f32
    %197 = vector.broadcast %cst_75 : f32 to vector<2x256xf32>
    %198 = arith.select %61, %196, %197 : vector<2x256xi1>, vector<2x256xf32>
    %c0_76 = arith.constant 0 : index
    %c18 = arith.constant 18 : index
    %c0_77 = arith.constant 0 : index
    %199 = vector.load %arg4[%c0_76, %c18, %c0_77] : memref<2x25x256xf32, #tpu.memory_space<vmem>>, vector<2x1x256xf32>
    %200 = vector.shape_cast %199 : vector<2x1x256xf32> to vector<2x256xf32>
    %201 = arith.mulf %198, %200 : vector<2x256xf32>
    %202 = arith.addf %195, %201 : vector<2x256xf32>
    %203 = vector.extract_strided_slice %6 {offsets = [0, 52], sizes = [2, 256], strides = [1, 1]} : vector<2x324xf32> to vector<2x256xf32>
    %cst_78 = arith.constant 0.000000e+00 : f32
    %204 = vector.broadcast %cst_78 : f32 to vector<2x256xf32>
    %205 = arith.select %70, %203, %204 : vector<2x256xi1>, vector<2x256xf32>
    %c0_79 = arith.constant 0 : index
    %c19 = arith.constant 19 : index
    %c0_80 = arith.constant 0 : index
    %206 = vector.load %arg4[%c0_79, %c19, %c0_80] : memref<2x25x256xf32, #tpu.memory_space<vmem>>, vector<2x1x256xf32>
    %207 = vector.shape_cast %206 : vector<2x1x256xf32> to vector<2x256xf32>
    %208 = arith.mulf %205, %207 : vector<2x256xf32>
    %209 = arith.addf %202, %208 : vector<2x256xf32>
    %210 = vector.extract_strided_slice %6 {offsets = [0, 64], sizes = [2, 256], strides = [1, 1]} : vector<2x324xf32> to vector<2x256xf32>
    %cst_81 = arith.constant 0.000000e+00 : f32
    %211 = vector.broadcast %cst_81 : f32 to vector<2x256xf32>
    %212 = arith.select %34, %210, %211 : vector<2x256xi1>, vector<2x256xf32>
    %c0_82 = arith.constant 0 : index
    %c20 = arith.constant 20 : index
    %c0_83 = arith.constant 0 : index
    %213 = vector.load %arg4[%c0_82, %c20, %c0_83] : memref<2x25x256xf32, #tpu.memory_space<vmem>>, vector<2x1x256xf32>
    %214 = vector.shape_cast %213 : vector<2x1x256xf32> to vector<2x256xf32>
    %215 = arith.mulf %212, %214 : vector<2x256xf32>
    %216 = arith.addf %209, %215 : vector<2x256xf32>
    %217 = vector.extract_strided_slice %6 {offsets = [0, 65], sizes = [2, 256], strides = [1, 1]} : vector<2x324xf32> to vector<2x256xf32>
    %cst_84 = arith.constant 0.000000e+00 : f32
    %218 = vector.broadcast %cst_84 : f32 to vector<2x256xf32>
    %219 = arith.select %43, %217, %218 : vector<2x256xi1>, vector<2x256xf32>
    %c0_85 = arith.constant 0 : index
    %c21 = arith.constant 21 : index
    %c0_86 = arith.constant 0 : index
    %220 = vector.load %arg4[%c0_85, %c21, %c0_86] : memref<2x25x256xf32, #tpu.memory_space<vmem>>, vector<2x1x256xf32>
    %221 = vector.shape_cast %220 : vector<2x1x256xf32> to vector<2x256xf32>
    %222 = arith.mulf %219, %221 : vector<2x256xf32>
    %223 = arith.addf %216, %222 : vector<2x256xf32>
    %224 = vector.extract_strided_slice %6 {offsets = [0, 66], sizes = [2, 256], strides = [1, 1]} : vector<2x324xf32> to vector<2x256xf32>
    %cst_87 = arith.constant 0.000000e+00 : f32
    %225 = vector.broadcast %cst_87 : f32 to vector<2x256xf32>
    %226 = arith.select %52, %224, %225 : vector<2x256xi1>, vector<2x256xf32>
    %c0_88 = arith.constant 0 : index
    %c22 = arith.constant 22 : index
    %c0_89 = arith.constant 0 : index
    %227 = vector.load %arg4[%c0_88, %c22, %c0_89] : memref<2x25x256xf32, #tpu.memory_space<vmem>>, vector<2x1x256xf32>
    %228 = vector.shape_cast %227 : vector<2x1x256xf32> to vector<2x256xf32>
    %229 = arith.mulf %226, %228 : vector<2x256xf32>
    %230 = arith.addf %223, %229 : vector<2x256xf32>
    %231 = vector.extract_strided_slice %6 {offsets = [0, 67], sizes = [2, 256], strides = [1, 1]} : vector<2x324xf32> to vector<2x256xf32>
    %cst_90 = arith.constant 0.000000e+00 : f32
    %232 = vector.broadcast %cst_90 : f32 to vector<2x256xf32>
    %233 = arith.select %61, %231, %232 : vector<2x256xi1>, vector<2x256xf32>
    %c0_91 = arith.constant 0 : index
    %c23 = arith.constant 23 : index
    %c0_92 = arith.constant 0 : index
    %234 = vector.load %arg4[%c0_91, %c23, %c0_92] : memref<2x25x256xf32, #tpu.memory_space<vmem>>, vector<2x1x256xf32>
    %235 = vector.shape_cast %234 : vector<2x1x256xf32> to vector<2x256xf32>
    %236 = arith.mulf %233, %235 : vector<2x256xf32>
    %237 = arith.addf %230, %236 : vector<2x256xf32>
    %238 = vector.extract_strided_slice %6 {offsets = [0, 68], sizes = [2, 256], strides = [1, 1]} : vector<2x324xf32> to vector<2x256xf32>
    %cst_93 = arith.constant 0.000000e+00 : f32
    %239 = vector.broadcast %cst_93 : f32 to vector<2x256xf32>
    %240 = arith.select %70, %238, %239 : vector<2x256xi1>, vector<2x256xf32>
    %c0_94 = arith.constant 0 : index
    %c24 = arith.constant 24 : index
    %c0_95 = arith.constant 0 : index
    %241 = vector.load %arg4[%c0_94, %c24, %c0_95] : memref<2x25x256xf32, #tpu.memory_space<vmem>>, vector<2x1x256xf32>
    %242 = vector.shape_cast %241 : vector<2x1x256xf32> to vector<2x256xf32>
    %243 = arith.mulf %240, %242 : vector<2x256xf32>
    %244 = arith.addf %237, %243 : vector<2x256xf32>
    %c0_96 = arith.constant 0 : index
    %c0_97 = arith.constant 0 : index
    %245 = vector.load %arg5[%c0_96, %c0_97] : memref<2x256xf32, #tpu.memory_space<vmem>>, vector<2x256xf32>
    tpu.vector_store %arg5[%c0_96, %c0_97], %244 {strides = array<i32>} : memref<2x256xf32, #tpu.memory_space<vmem>>, vector<2x256xf32>,
    return
  }
  func.func @transform_0(%arg0: i32, %arg1: i32) -> (i32, i32) {
    %c0_i32 = arith.constant 0 : i32
    %c0_i32_0 = arith.constant 0 : i32
    return %arg0, %c0_i32 : i32, i32
  }
  func.func @transform_1(%arg0: i32, %arg1: i32) -> (i32, i32) {
    %c0_i32 = arith.constant 0 : i32
    %c0_i32_0 = arith.constant 0 : i32
    return %arg0, %c0_i32 : i32, i32
  }
  func.func @transform_2(%arg0: i32, %arg1: i32) -> (i32, i32, i32) {
    %c0_i32 = arith.constant 0 : i32
    %c0_i32_0 = arith.constant 0 : i32
    return %arg0, %c0_i32, %arg1 : i32, i32, i32
  }
  func.func @transform_3(%arg0: i32, %arg1: i32) -> (i32, i32) {
    %c0_i32 = arith.constant 0 : i32
    return %arg0, %arg1 : i32, i32
  }
}

</mosaic_0001>

<bundles_post_ra>
// kernel: tpu_custom_call.1
= control target key start
LH: loop header
LB: loop body
LE: loop exit
PB: predicated region body
PF: predicated region fallthrough
CT: control target
= control target key end

     0   :  { %s1561_s0 = inlined_call_operand.vmem [shape: f32[2,324], index: 0, kind: input, shape index: {}]   ;;  %s1562_s1 = inlined_call_operand.vmem [shape: f32[2,324], index: 1, kind: input, shape index: {}]   ;;  %s1563_s2 = inlined_call_operand.vmem [shape: f32[2,25,256], index: 2, kind: input, shape index: {}]   ;;  %s1564_s3 = inlined_call_operand.hbm [shape: f32[2,256], index: 3, kind: output, shape index: {}]  }
   0x1   :  { %v20_v0 = vld [vmem:[%s1561_s0] sm:$0x3f] }
   0x2   :  { %v23_v1 = vld [vmem:[%s1562_s1] sm:$0x3f] }
   0x3   :  { %v1109_v2 = vmax.f32 %v20_v0, %v23_v1 }
   0x5   :  { %94 = vst [vmem:[#allocation1] ss:$4 sm:$0xff] %v1109_v2 }
   0x6   :  { %8 = vsyncpa [#allocation3], 0  ;;  %v101_v3 = vld [vmem:[%s1563_s2] ss:$8 sm:$0x3]  ;;  %s1058_s22 = smov 127  }
   0x7   :  { %v958_v4 = vld [vmem:[%s1563_s2 + $0x40] ss:$8 sm:$0x3]  ;;  %v959_v9 = vld [vmem:[%s1563_s2 + $0x1] ss:$8 sm:$0x3] }
   0x8   :  { %v960_v10 = vld [vmem:[%s1563_s2 + $0x41] ss:$8 sm:$0x3]  ;;  %v961_v16 = vld [vmem:[%s1563_s2 + $0x2] ss:$8 sm:$0x3] }
   0x9   :  { %v962_v17 = vld [vmem:[%s1563_s2 + $0x42] ss:$8 sm:$0x3]  ;;  %s1059_s27 = smov 126   ;;  %s1060_s5 = smov 125   ;;  %vm125_vm0 = vcmask 1039360  }
   0xa   :  { %v963_v23 = vld [vmem:[%s1563_s2 + $0x3] ss:$8 sm:$0x3]  ;;  %v965_v30 = vld [vmem:[%s1563_s2 + $0x4] ss:$8 sm:$0x3] }
   0xb   :  { %v964_v24 = vld [vmem:[%s1563_s2 + $0x43] ss:$8 sm:$0x3]  ;;  %v966_v31 = vld [vmem:[%s1563_s2 + $0x44] ss:$8 sm:$0x3] }
   0xc   :  { %v1118_v5 = vld.sshfl [vmem:[#allocation1] sm:$0xff pattern:$0x73625140]  ;;  %v1120_v6 = vld.sshfl [vmem:[#allocation1 + $0x8] sm:$0xff pattern:$0x73625140] }
   0xd   :  { %106 = vst [vmem:[#allocation1] ss:$9 sm:$0xff] %v101_v3  ;;  %s1061_s10 = smov 124   ;;  %v967_v37 = vld [vmem:[%s1563_s2 + $0x5] ss:$8 sm:$0x3] }
   0xe   :  { %108 = vst [vmem:[#allocation1 + $0x1] ss:$9 sm:$0xff] %v958_v4  ;;  %v968_v38 = vld [vmem:[%s1563_s2 + $0x45] ss:$8 sm:$0x3]  ;;  %s1062_s15 = smov 112  }
   0xf   :  { %v969_v44 = vld [vmem:[%s1563_s2 + $0x6] ss:$8 sm:$0x3]  ;;  %s1063_s0 = smov 111   ;;  %s1064_s23 = smov 110   ;;  %vm159_vm1 = vcmask 1031168  }
  0x10   :  { %v970_v45 = vld [vmem:[%s1563_s2 + $0x46] ss:$8 sm:$0x3]  ;;  %v971_v51 = vld [vmem:[%s1563_s2 + $0x7] ss:$8 sm:$0x3] }
  0x11   :  { %v972_v52 = vld [vmem:[%s1563_s2 + $0x47] ss:$8 sm:$0x3]  ;;  %v973_v58 = vld [vmem:[%s1563_s2 + $0x10] ss:$8 sm:$0x3] }
  0x12   :  { %v974_v59 = vld [vmem:[%s1563_s2 + $0x50] ss:$8 sm:$0x3]  ;;  %s1065_s28 = smov 109   ;;  %s1066_s6 = smov 108   ;;  %vm193_vm2 = vcmask 1022976  }
  0x13   :  { %v975_v1 = vld [vmem:[%s1563_s2 + $0x11] ss:$8 sm:$0x3]  ;;  %s1067_s11 = smov 96   ;;  %s1068_s16 = smov 95   ;;  %vm227_vm9 = vcmask 1014784  }
  0x14   :  { %v976_v3 = vld [vmem:[%s1563_s2 + $0x51] ss:$8 sm:$0x3]  ;;  %s1069_s1 = smov 94   ;;  %s1070_s24 = smov 93   ;;  %vm261_vm12 = vcmask 916480  }
  0x15   :  { %v1122_v7 = vld [vmem:[#allocation1] sm:$0xff]  ;;  %v1124_v8 = vld [vmem:[#allocation1 + $0x9] sm:$0xff]  ;;  %s1071_s29 = smov 92   ;;  %s1072_s7 = smov 80   ;;  %vm295_vm13 = vcmask 908288   ;;  %vm329_vm14 = vcmask 900096  }
  0x16   :  { %115 = vst [vmem:[#allocation1] ss:$4 sm:$0xff] %v1109_v2  ;;  %s1073_s12 = smov 79   ;;  %vm363_vm15 = vcmask 891904   ;;  %s1074_s17 = smov 78  }
  0x17   :  { %s1075_s20 = smov 77   ;;  %s1076_s25 = smov 76  }
  0x18   :  { %s1077_s30 = smov 64   ;;  %s1078_s8 = smov 63  }
  0x19   :  { %s1079_s13 = smov 62   ;;  %s1080_s18 = smov 61  }
  0x1a   :  { %s1081_s19 = smov 60  }
  0x1d   :  { %v118_v11 = vld.sshfl [vmem:[#allocation1 + $0x10] sm:$0xff pattern:$0x73625140]  ;;  %v116_v12 = vld.sshfl [vmem:[#allocation1] sm:$0xff pattern:$0x73625140] }
  0x1e   :  { %123 = vrot.lane.b32.xlu1 %v118_v11, %s1058_s22  ;;  %119 = vrot.lane.b32.xlu0 %v116_v12, %s1058_s22  ;;  %v117_v13 = vld.sshfl [vmem:[#allocation1 + $0x8] sm:$0xff pattern:$0x73625140] }
  0x1f   :  { %138 = vst [vmem:[#allocation1] ss:$9 sm:$0xff] %v959_v9 }
  0x20   :  { %140 = vst [vmem:[#allocation1 + $0x1] ss:$9 sm:$0xff] %v960_v10 }
  0x26   :  { %121 = vrot.lane.b32.xlu0 %v117_v13, %s1058_s22  ;;  %v977_v13 = vld [vmem:[%s1563_s2 + $0x12] ss:$8 sm:$0x3] }
  0x27   :  { %v1133_v14 = vld [vmem:[#allocation1] sm:$0xff]  ;;  %v1135_v15 = vld [vmem:[#allocation1 + $0x9] sm:$0xff] }
  0x28   :  { %149 = vst [vmem:[#allocation1] ss:$4 sm:$0xff] %v1109_v2 }
  0x2f   :  { %v150_v18 = vld.sshfl [vmem:[#allocation1] sm:$0xff pattern:$0x73625140]  ;;  %v151_v19 = vld.sshfl [vmem:[#allocation1 + $0x8] sm:$0xff pattern:$0x73625140] }
  0x30   :  { %v152_v20 = vld.sshfl [vmem:[#allocation1 + $0x10] sm:$0xff pattern:$0x73625140]  ;;  %153 = vrot.lane.b32.xlu1 %v150_v18, %s1059_s27  ;;  %155 = vrot.lane.b32.xlu2 %v151_v19, %s1059_s27 }
  0x31   :  { %172 = vst [vmem:[#allocation1] ss:$9 sm:$0xff] %v961_v16  ;;  %v978_v16 = vld [vmem:[%s1563_s2 + $0x52] ss:$8 sm:$0x3] }
  0x32   :  { %174 = vst [vmem:[#allocation1 + $0x1] ss:$9 sm:$0xff] %v962_v17 }
  0x38   :  { %157 = vrot.lane.b32.xlu2 %v152_v20, %s1059_s27 }
  0x39   :  { %v1144_v21 = vld [vmem:[#allocation1] sm:$0xff]  ;;  %v1146_v22 = vld [vmem:[#allocation1 + $0x9] sm:$0xff] }
  0x3a   :  { %183 = vst [vmem:[#allocation1] ss:$4 sm:$0xff] %v1109_v2 }
  0x41   :  { %v185_v25 = vld.sshfl [vmem:[#allocation1 + $0x8] sm:$0xff pattern:$0x73625140]  ;;  %v186_v26 = vld.sshfl [vmem:[#allocation1 + $0x10] sm:$0xff pattern:$0x73625140] }
  0x42   :  { %189 = vrot.lane.b32.xlu1 %v185_v25, %s1060_s5  ;;  %v184_v27 = vld.sshfl [vmem:[#allocation1] sm:$0xff pattern:$0x73625140]  ;;  %191 = vrot.lane.b32.xlu2 %v186_v26, %s1060_s5  ;;  %v980_v25 = vld [vmem:[%s1563_s2 + $0x53] ss:$8 sm:$0x3] }
  0x43   :  { %187 = vrot.lane.b32.xlu0 %v184_v27, %s1060_s5  ;;  %206 = vst [vmem:[#allocation1] ss:$9 sm:$0xff] %v963_v23 }
  0x44   :  { %208 = vst [vmem:[#allocation1 + $0x1] ss:$9 sm:$0xff] %v964_v24  ;;  %v979_v24 = vld [vmem:[%s1563_s2 + $0x13] ss:$8 sm:$0x3] }
  0x4b   :  { %v1155_v28 = vld [vmem:[#allocation1] sm:$0xff]  ;;  %v1157_v29 = vld [vmem:[#allocation1 + $0x9] sm:$0xff] }
  0x4c   :  { %217 = vst [vmem:[#allocation1] ss:$4 sm:$0xff] %v1109_v2 }
  0x53   :  { %v219_v32 = vld.sshfl [vmem:[#allocation1 + $0x8] sm:$0xff pattern:$0x73625140]  ;;  %v220_v33 = vld.sshfl [vmem:[#allocation1 + $0x10] sm:$0xff pattern:$0x73625140] }
  0x54   :  { %223 = vrot.lane.b32.xlu1 %v219_v32, %s1061_s10  ;;  %v218_v34 = vld.sshfl [vmem:[#allocation1] sm:$0xff pattern:$0x73625140]  ;;  %225 = vrot.lane.b32.xlu2 %v220_v33, %s1061_s10  ;;  %v981_v33 = vld [vmem:[%s1563_s2 + $0x14] ss:$8 sm:$0x3] }
  0x55   :  { %221 = vrot.lane.b32.xlu0 %v218_v34, %s1061_s10  ;;  %240 = vst [vmem:[#allocation1] ss:$9 sm:$0xff] %v965_v30  ;;  %v982_v34 = vld [vmem:[%s1563_s2 + $0x54] ss:$8 sm:$0x3] }
  0x56   :  { %242 = vst [vmem:[#allocation1 + $0x1] ss:$9 sm:$0xff] %v966_v31 }
  0x5d   :  { %v1166_v35 = vld [vmem:[#allocation1] sm:$0xff]  ;;  %v1168_v36 = vld [vmem:[#allocation1 + $0x9] sm:$0xff] }
  0x5e   :  { %251 = vst [vmem:[#allocation1] ss:$4 sm:$0xff] %v1109_v2 }
  0x65   :  { %v253_v39 = vld.sshfl [vmem:[#allocation1 + $0x8] sm:$0xff pattern:$0x73625140]  ;;  %v254_v40 = vld.sshfl [vmem:[#allocation1 + $0x10] sm:$0xff pattern:$0x73625140] }
  0x66   :  { %257 = vrot.lane.b32.xlu1 %v253_v39, %s1062_s15  ;;  %v252_v41 = vld.sshfl [vmem:[#allocation1] sm:$0xff pattern:$0x73625140]  ;;  %259 = vrot.lane.b32.xlu2 %v254_v40, %s1062_s15 }
  0x67   :  { %255 = vrot.lane.b32.xlu0 %v252_v41, %s1062_s15  ;;  %274 = vst [vmem:[#allocation1] ss:$9 sm:$0xff] %v967_v37 }
  0x68   :  { %276 = vst [vmem:[#allocation1 + $0x1] ss:$9 sm:$0xff] %v968_v38 }
  0x6f   :  { %v1177_v42 = vld [vmem:[#allocation1] sm:$0xff]  ;;  %v1179_v43 = vld [vmem:[#allocation1 + $0x9] sm:$0xff] }
  0x70   :  { %285 = vst [vmem:[#allocation1] ss:$4 sm:$0xff] %v1109_v2 }
  0x77   :  { %v287_v46 = vld.sshfl [vmem:[#allocation1 + $0x8] sm:$0xff pattern:$0x73625140]  ;;  %v288_v47 = vld.sshfl [vmem:[#allocation1 + $0x10] sm:$0xff pattern:$0x73625140] }
  0x78   :  { %291 = vrot.lane.b32.xlu1 %v287_v46, %s1063_s0  ;;  %v286_v48 = vld.sshfl [vmem:[#allocation1] sm:$0xff pattern:$0x73625140]  ;;  %293 = vrot.lane.b32.xlu2 %v288_v47, %s1063_s0  ;;  %v983_v47 = vld [vmem:[%s1563_s2 + $0x15] ss:$8 sm:$0x3] }
  0x79   :  { %289 = vrot.lane.b32.xlu0 %v286_v48, %s1063_s0  ;;  %308 = vst [vmem:[#allocation1] ss:$9 sm:$0xff] %v969_v44  ;;  %v984_v48 = vld [vmem:[%s1563_s2 + $0x55] ss:$8 sm:$0x3] }
  0x7a   :  { %310 = vst [vmem:[#allocation1 + $0x1] ss:$9 sm:$0xff] %v970_v45 }
  0x81   :  { %v1188_v49 = vld [vmem:[#allocation1] sm:$0xff]  ;;  %v1190_v50 = vld [vmem:[#allocation1 + $0x9] sm:$0xff] }
  0x82   :  { %319 = vst [vmem:[#allocation1] ss:$4 sm:$0xff] %v1109_v2 }
  0x89   :  { %v321_v53 = vld.sshfl [vmem:[#allocation1 + $0x8] sm:$0xff pattern:$0x73625140]  ;;  %v322_v54 = vld.sshfl [vmem:[#allocation1 + $0x10] sm:$0xff pattern:$0x73625140] }
  0x8a   :  { %325 = vrot.lane.b32.xlu1 %v321_v53, %s1064_s23  ;;  %v320_v55 = vld.sshfl [vmem:[#allocation1] sm:$0xff pattern:$0x73625140]  ;;  %327 = vrot.lane.b32.xlu2 %v322_v54, %s1064_s23  ;;  %v156_v45 = vpop.permute.xlu2 %155  ;;  %v25_v54 = vlaneseq }
  0x8b   :  { %323 = vrot.lane.b32.xlu0 %v320_v55, %s1064_s23  ;;  %342 = vst [vmem:[#allocation1] ss:$9 sm:$0xff] %v971_v51 }
  0x8c   :  { %344 = vst [vmem:[#allocation1 + $0x1] ss:$9 sm:$0xff] %v972_v52 }
  0x90   :  { %v120_v44 = vpop.permute.xlu0 %119  ;;  %v124_v46 = vpop.permute.xlu1 %123 }
  0x93   :  { %v1199_v56 = vld [vmem:[#allocation1] sm:$0xff]  ;;  %v1201_v57 = vld [vmem:[#allocation1 + $0x9] sm:$0xff] }
  0x94   :  { %353 = vst [vmem:[#allocation1] ss:$4 sm:$0xff] %v1109_v2 }
  0x98   :  { %v122_v55 = vpop.permute.xlu0 %121 }
  0x9b   :  { %v355_v60 = vld.sshfl [vmem:[#allocation1 + $0x8] sm:$0xff pattern:$0x73625140]  ;;  %v356_v61 = vld.sshfl [vmem:[#allocation1 + $0x10] sm:$0xff pattern:$0x73625140] }
  0x9c   :  { %359 = vrot.lane.b32.xlu1 %v355_v60, %s1065_s28  ;;  %v354_v62 = vld.sshfl [vmem:[#allocation1] sm:$0xff pattern:$0x73625140]  ;;  %361 = vrot.lane.b32.xlu2 %v356_v61, %s1065_s28  ;;  %v127_v60 = vsel %vm125_vm0, %v122_v55, %v124_v46 }
  0x9d   :  { %357 = vrot.lane.b32.xlu0 %v354_v62, %s1065_s28  ;;  %376 = vst [vmem:[#allocation1] ss:$9 sm:$0xff] %v973_v58  ;;  %v158_v58 = vpop.permute.xlu2 %157 }
  0x9e   :  { %378 = vst [vmem:[#allocation1 + $0x1] ss:$9 sm:$0xff] %v974_v59  ;;  %v126_v59 = vsel %vm125_vm0, %v120_v44, %v122_v55  ;;  %v161_v61 = vsel %vm159_vm1, %v156_v45, %v158_v58  ;;  %v986_v44 = vld [vmem:[%s1563_s2 + $0x56] ss:$8 sm:$0x3]  ;;  %vm397_vm0 = vcmask 883712  }
  0xa2   :  { %v154_v62 = vpop.permute.xlu1 %153 }
  0xa5   :  { %v1210_v63 = vld [vmem:[#allocation1] sm:$0xff]  ;;  %v1212_v0 = vld [vmem:[#allocation1 + $0x9] sm:$0xff] }
  0xa6   :  { %387 = vst [vmem:[#allocation1] ss:$4 sm:$0xff] %v1109_v2 }
  0xad   :  { %v389_v4 = vld.sshfl [vmem:[#allocation1 + $0x8] sm:$0xff pattern:$0x73625140]  ;;  %v390_v9 = vld.sshfl [vmem:[#allocation1 + $0x10] sm:$0xff pattern:$0x73625140] }
  0xae   :  { %393 = vrot.lane.b32.xlu1 %v389_v4, %s1066_s6  ;;  %v388_v10 = vld.sshfl [vmem:[#allocation1] sm:$0xff pattern:$0x73625140]  ;;  %395 = vrot.lane.b32.xlu2 %v390_v9, %s1066_s6 }
  0xaf   :  { %391 = vrot.lane.b32.xlu0 %v388_v10, %s1066_s6  ;;  %410 = vst [vmem:[#allocation1] ss:$9 sm:$0xff] %v975_v1  ;;  %v26_v1 = vand.u32 127, %v25_v54 }
  0xb0   :  { %412 = vst [vmem:[#allocation1 + $0x1] ss:$9 sm:$0xff] %v976_v3  ;;  %v160_v3 = vsel %vm159_vm1, %v154_v62, %v156_v45  ;;  %vm431_vm1 = vcmask 785408  }
  0xb1   :  { %v27_v10 = vadd.s32 128, %v26_v1 }
  0xb7   :  { %v1221_v11 = vld [vmem:[#allocation1] sm:$0xff]  ;;  %v1223_v12 = vld [vmem:[#allocation1 + $0x9] sm:$0xff] }
  0xb8   :  { %421 = vst [vmem:[#allocation1] ss:$4 sm:$0xff] %v1109_v2 }
  0xbf   :  { %v423_v17 = vld.sshfl [vmem:[#allocation1 + $0x8] sm:$0xff pattern:$0x73625140]  ;;  %v424_v18 = vld.sshfl [vmem:[#allocation1 + $0x10] sm:$0xff pattern:$0x73625140] }
  0xc0   :  { %427 = vrot.lane.b32.xlu1 %v423_v17, %s1067_s11  ;;  %v422_v19 = vld.sshfl [vmem:[#allocation1] sm:$0xff pattern:$0x73625140]  ;;  %429 = vrot.lane.b32.xlu2 %v424_v18, %s1067_s11 }
  0xc1   :  { %425 = vrot.lane.b32.xlu0 %v422_v19, %s1067_s11  ;;  %444 = vst [vmem:[#allocation1] ss:$9 sm:$0xff] %v977_v13  ;;  %v35_v13 = vand.u32 15, %v26_v1 }
  0xc2   :  { %446 = vst [vmem:[#allocation1 + $0x1] ss:$9 sm:$0xff] %v978_v16  ;;  %v42_v16 = vand.u32 15, %v27_v10 }
  0xc3   :  { %v1270_v17 = vadd.s32 4294967294, %v35_v13  ;;  %v1272_v18 = vadd.s32 4294967295, %v35_v13  ;;  %v1274_v19 = vadd.s32 1, %v35_v13 }
  0xc5   :  { %vm57_vm3 = vcmp.ge.s32.totalorder %v1270_v17, 0  ;;  %vm65_vm4 = vcmp.ge.s32.totalorder %v1272_v18, 0  ;;  %vm81_vm5 = vcmp.lt.s32.totalorder %v1274_v19, 16 }
  0xc9   :  { %v1232_v20 = vld [vmem:[#allocation1] sm:$0xff]  ;;  %v1234_v23 = vld [vmem:[#allocation1 + $0x9] sm:$0xff] }
  0xca   :  { %455 = vst [vmem:[#allocation1] ss:$4 sm:$0xff] %v1109_v2 }
  0xd1   :  { %v457_v26 = vld.sshfl [vmem:[#allocation1 + $0x8] sm:$0xff pattern:$0x73625140]  ;;  %v458_v27 = vld.sshfl [vmem:[#allocation1 + $0x10] sm:$0xff pattern:$0x73625140] }
  0xd2   :  { %461 = vrot.lane.b32.xlu1 %v457_v26, %s1068_s16  ;;  %v456_v30 = vld.sshfl [vmem:[#allocation1] sm:$0xff pattern:$0x73625140]  ;;  %463 = vrot.lane.b32.xlu2 %v458_v27, %s1068_s16  ;;  %v1278_v26 = vadd.s32 4294967294, %v42_v16  ;;  %v1281_v27 = vadd.s32 4294967295, %v42_v16 }
  0xd3   :  { %459 = vrot.lane.b32.xlu0 %v456_v30, %s1068_s16  ;;  %478 = vst [vmem:[#allocation1] ss:$9 sm:$0xff] %v979_v24  ;;  %v180_v24 = vmul.f32 %v1146_v22, %v161_v61  ;;  %v192_v30 = vpop.permute.xlu2 %191  ;;  %v1289_v22 = vadd.s32 1, %v42_v16 }
  0xd4   :  { %480 = vst [vmem:[#allocation1 + $0x1] ss:$9 sm:$0xff] %v980_v25  ;;  %v179_v25 = vmul.f32 %v1144_v21, %v160_v3  ;;  %v190_v21 = vpop.permute.xlu1 %189  ;;  %vm58_vm6 = vcmp.ge.s32.totalorder %v1278_v26, 0  ;;  %vm66_vm7 = vcmp.ge.s32.totalorder %v1281_v27, 0  ;;  %v1318_v3 = vadd.s32 2, %v42_v16 }
  0xd5   :  { %v100_v45 = vsel %vm58_vm6, %v1120_v6, 0.0  ;;  %v131_v46 = vsel %vm66_vm7, %v127_v60, 0.0  ;;  %vm82_vm8 = vcmp.lt.s32.totalorder %v1289_v22, 16 }
  0xd6   :  { %vm90_vm10 = vcmp.lt.s32.totalorder %v1318_v3, 16 }
  0xdb   :  { %v1243_v31 = vld [vmem:[#allocation1] sm:$0xff]  ;;  %v1245_v32 = vld [vmem:[#allocation1 + $0x9] sm:$0xff]  ;;  %v226_v1 = vpop.permute.xlu2 %225 }
  0xdc   :  { %489 = vst [vmem:[#allocation1] ss:$4 sm:$0xff] %v1109_v2  ;;  %v224_v10 = vpop.permute.xlu1 %223 }
  0xe3   :  { %v491_v37 = vld.sshfl [vmem:[#allocation1 + $0x8] sm:$0xff pattern:$0x73625140]  ;;  %v492_v38 = vld.sshfl [vmem:[#allocation1 + $0x10] sm:$0xff pattern:$0x73625140] }
  0xe4   :  { %495 = vrot.lane.b32.xlu1 %v491_v37, %s1069_s1  ;;  %v490_v39 = vld.sshfl [vmem:[#allocation1] sm:$0xff pattern:$0x73625140]  ;;  %497 = vrot.lane.b32.xlu2 %v492_v38, %s1069_s1  ;;  %v188_v37 = vpop.permute.xlu0 %187  ;;  %v985_v38 = vld [vmem:[%s1563_s2 + $0x16] ss:$8 sm:$0x3] }
  0xe5   :  { %493 = vrot.lane.b32.xlu0 %v490_v39, %s1069_s1  ;;  %512 = vst [vmem:[#allocation1] ss:$9 sm:$0xff] %v981_v33  ;;  %v99_v33 = vsel %vm57_vm3, %v1118_v5, 0.0 }
  0xe6   :  { %514 = vst [vmem:[#allocation1 + $0x1] ss:$9 sm:$0xff] %v982_v34  ;;  %v130_v34 = vsel %vm65_vm4, %v126_v59, 0.0  ;;  %v113_v39 = vmul.f32 %v1122_v7, %v99_v33  ;;  %v114_v7 = vmul.f32 %v1124_v8, %v100_v45  ;;  %v229_v33 = vsel %vm227_vm9, %v224_v10, %v226_v1 }
  0xe7   :  { %v145_v5 = vmul.f32 %v1133_v14, %v130_v34  ;;  %v146_v14 = vmul.f32 %v1135_v15, %v131_v46  ;;  %v987_v46 = vld [vmem:[%s1563_s2 + $0x17] ss:$8 sm:$0x3] }
  0xe9   :  { %v148_v58 = vadd.f32 %v146_v14, %v114_v7 }
  0xeb   :  { %v182_v60 = vadd.f32 %v180_v24, %v148_v58 }
  0xec   :  { %v222_v34 = vpop.permute.xlu0 %221 }
  0xed   :  { %v1254_v40 = vld [vmem:[#allocation1] sm:$0xff]  ;;  %v1256_v41 = vld [vmem:[#allocation1 + $0x9] sm:$0xff] }
  0xee   :  { %523 = vst [vmem:[#allocation1] ss:$4 sm:$0xff] %v1109_v2 }
  0xf4   :  { %v256_v45 = vpop.permute.xlu0 %255 }
  0xf5   :  { %v525_v51 = vld.sshfl [vmem:[#allocation1 + $0x8] sm:$0xff pattern:$0x73625140]  ;;  %v526_v52 = vld.sshfl [vmem:[#allocation1 + $0x10] sm:$0xff pattern:$0x73625140] }
  0xf6   :  { %529 = vrot.lane.b32.xlu1 %v525_v51, %s1070_s24  ;;  %v524_v53 = vld.sshfl [vmem:[#allocation1] sm:$0xff pattern:$0x73625140]  ;;  %531 = vrot.lane.b32.xlu2 %v526_v52, %s1070_s24  ;;  %v147_v52 = vadd.f32 %v145_v5, %v113_v39  ;;  %v260_v39 = vpop.permute.xlu2 %259  ;;  %v258_v5 = vpop.permute.xlu1 %257 }
  0xf7   :  { %527 = vrot.lane.b32.xlu0 %v524_v53, %s1070_s24  ;;  %546 = vst [vmem:[#allocation1] ss:$9 sm:$0xff] %v983_v47  ;;  %v195_v47 = vsel %vm193_vm2, %v190_v21, %v192_v30  ;;  %v194_v53 = vsel %vm193_vm2, %v188_v37, %v190_v21  ;;  %v1320_v30 = vadd.s32 2, %v35_v13  ;;  %vm465_vm2 = vcmask 777216  }
  0xf8   :  { %548 = vst [vmem:[#allocation1 + $0x1] ss:$9 sm:$0xff] %v984_v48  ;;  %v199_v6 = vsel %vm82_vm8, %v195_v47, 0.0  ;;  %v198_v55 = vsel %vm81_vm5, %v194_v53, 0.0  ;;  %v181_v59 = vadd.f32 %v179_v25, %v147_v52 }
  0xf9   :  { %v214_v8 = vmul.f32 %v1157_v29, %v199_v6  ;;  %v213_v15 = vmul.f32 %v1155_v28, %v198_v55  ;;  %vm89_vm11 = vcmp.lt.s32.totalorder %v1320_v30, 16  ;;  %v228_v29 = vsel %vm227_vm9, %v222_v34, %v224_v10 }
  0xfa   :  { %v233_v28 = vsel %vm90_vm10, %v229_v33, 0.0  ;;  %v232_v24 = vsel %vm89_vm11, %v228_v29, 0.0  ;;  %vm499_vm9 = vcmask 769024  }
  0xfb   :  { %v215_v61 = vadd.f32 %v213_v15, %v181_v59  ;;  %v216_v62 = vadd.f32 %v214_v8, %v182_v60  ;;  %v248_v13 = vmul.f32 %v1168_v36, %v233_v28  ;;  %v247_v21 = vmul.f32 %v1166_v35, %v232_v24  ;;  %v988_v35 = vld [vmem:[%s1563_s2 + $0x57] ss:$8 sm:$0x3] }
  0xfc   :  { %v290_v59 = vpop.permute.xlu0 %289 }
  0xfd   :  { %v250_v37 = vadd.f32 %v248_v13, %v216_v62 }
  0xfe   :  { %v294_v55 = vpop.permute.xlu2 %293  ;;  %v292_v58 = vpop.permute.xlu1 %291 }
  0xff   :  { %v1265_v4 = vld [vmem:[#allocation1] sm:$0xff]  ;;  %v1267_v9 = vld [vmem:[#allocation1 + $0x9] sm:$0xff]  ;;  %v296_v15 = vsel %vm295_vm13, %v290_v59, %v292_v58 }
 0x100   :  { %557 = vst [vmem:[#allocation1] ss:$4 sm:$0xff] %v1109_v2  ;;  %v300_v60 = vsel %vm65_vm4, %v296_v15, 0.0 }
 0x101   :  { %v315_v1 = vmul.f32 %v1188_v49, %v300_v60  ;;  %v990_v49 = vld [vmem:[%s1563_s2 + $0x60] ss:$8 sm:$0x3] }
 0x104   :  { %v324_v24 = vpop.permute.xlu0 %323 }
 0x106   :  { %v328_v34 = vpop.permute.xlu2 %327  ;;  %v326_v29 = vpop.permute.xlu1 %325 }
 0x107   :  { %v559_v48 = vld.sshfl [vmem:[#allocation1 + $0x8] sm:$0xff pattern:$0x73625140]  ;;  %v560_v51 = vld.sshfl [vmem:[#allocation1 + $0x10] sm:$0xff pattern:$0x73625140]  ;;  %v331_v28 = vsel %vm329_vm14, %v326_v29, %v328_v34  ;;  %v330_v13 = vsel %vm329_vm14, %v324_v24, %v326_v29 }
 0x108   :  { %563 = vrot.lane.b32.xlu1 %v559_v48, %s1071_s29  ;;  %v558_v54 = vld.sshfl [vmem:[#allocation1] sm:$0xff pattern:$0x73625140]  ;;  %565 = vrot.lane.b32.xlu2 %v560_v51, %s1071_s29  ;;  %v262_v48 = vsel %vm261_vm12, %v256_v45, %v258_v5  ;;  %vm601_vm14 = vcmask 654336  }
 0x109   :  { %561 = vrot.lane.b32.xlu0 %v558_v54, %s1071_s29  ;;  %580 = vst [vmem:[#allocation1] ss:$9 sm:$0xff] %v985_v38  ;;  %v249_v38 = vadd.f32 %v247_v21, %v215_v61  ;;  %v266_v51 = vsel %vm57_vm3, %v262_v48, 0.0  ;;  %v989_v21 = vld [vmem:[%s1563_s2 + $0x20] ss:$8 sm:$0x3] }
 0x10a   :  { %582 = vst [vmem:[#allocation1 + $0x1] ss:$9 sm:$0xff] %v986_v44  ;;  %v263_v44 = vsel %vm261_vm12, %v258_v5, %v260_v39  ;;  %v281_v52 = vmul.f32 %v1177_v42, %v266_v51  ;;  %vm533_vm12 = vcmask 760832  }
 0x10b   :  { %v267_v47 = vsel %vm58_vm6, %v263_v44, 0.0 }
 0x10c   :  { %v282_v36 = vmul.f32 %v1179_v43, %v267_v47  ;;  %v283_v6 = vadd.f32 %v281_v52, %v249_v38  ;;  %v297_v43 = vsel %vm295_vm13, %v292_v58, %v294_v55  ;;  %vm567_vm13 = vcmask 752640  }
 0x10d   :  { %v301_v8 = vsel %vm66_vm7, %v297_v43, 0.0 }
 0x10e   :  { %v284_v54 = vadd.f32 %v282_v36, %v250_v37  ;;  %v316_v42 = vmul.f32 %v1190_v50, %v301_v8  ;;  %v317_v33 = vadd.f32 %v315_v1, %v283_v6  ;;  %v350_v50 = vmul.f32 %v1201_v57, %v331_v28  ;;  %v362_v57 = vpop.permute.xlu2 %361 }
 0x10f   :  { %v349_v37 = vmul.f32 %v1199_v56, %v330_v13  ;;  %v358_v48 = vpop.permute.xlu0 %357 }
 0x110   :  { %v318_v10 = vadd.f32 %v316_v42, %v284_v54 }
 0x111   :  { %v1328_v25 = vld [vmem:[#allocation1] sm:$0xff]  ;;  %v1330_v16 = vld [vmem:[#allocation1 + $0x9] sm:$0xff]  ;;  %v351_v45 = vadd.f32 %v349_v37, %v317_v33 }
 0x112   :  { %591 = vst [vmem:[#allocation1] ss:$4 sm:$0xff] %v1109_v2  ;;  %v352_v5 = vadd.f32 %v350_v50, %v318_v10 }
 0x116   :  { %v396_v6 = vpop.permute.xlu2 %395 }
 0x119   :  { %v593_v7 = vld.sshfl [vmem:[#allocation1 + $0x8] sm:$0xff pattern:$0x73625140]  ;;  %v594_v14 = vld.sshfl [vmem:[#allocation1 + $0x10] sm:$0xff pattern:$0x73625140] }
 0x11a   :  { %597 = vrot.lane.b32.xlu1 %v593_v7, %s1072_s7  ;;  %v592_v53 = vld.sshfl [vmem:[#allocation1] sm:$0xff pattern:$0x73625140]  ;;  %599 = vrot.lane.b32.xlu2 %v594_v14, %s1072_s7 }
 0x11b   :  { %595 = vrot.lane.b32.xlu0 %v592_v53, %s1072_s7  ;;  %614 = vst [vmem:[#allocation1] ss:$9 sm:$0xff] %v987_v46  ;;  %v360_v46 = vpop.permute.xlu1 %359 }
 0x11c   :  { %616 = vst [vmem:[#allocation1 + $0x1] ss:$9 sm:$0xff] %v988_v35  ;;  %v365_v47 = vsel %vm363_vm15, %v360_v46, %v362_v57  ;;  %v364_v56 = vsel %vm363_vm15, %v358_v48, %v360_v46  ;;  %vm635_vm15 = vcmask 646144  }
 0x11d   :  { %v369_v35 = vsel %vm82_vm8, %v365_v47, 0.0  ;;  %v368_v51 = vsel %vm81_vm5, %v364_v56, 0.0 }
 0x11e   :  { %v384_v36 = vmul.f32 %v1212_v0, %v369_v35  ;;  %v383_v52 = vmul.f32 %v1210_v63, %v368_v51  ;;  %v991_v0 = vld [vmem:[%s1563_s2 + $0x21] ss:$8 sm:$0x3]  ;;  %v430_v28 = vpop.permute.xlu2 %429 }
 0x11f   :  { %v992_v63 = vld [vmem:[%s1563_s2 + $0x61] ss:$8 sm:$0x3] }
 0x120   :  { %v386_v53 = vadd.f32 %v384_v36, %v352_v5  ;;  %v385_v54 = vadd.f32 %v383_v52, %v351_v45 }
 0x121   :  { %v392_v43 = vpop.permute.xlu0 %391 }
 0x123   :  { %v1352_v61 = vld [vmem:[#allocation1] sm:$0xff]  ;;  %v1354_v62 = vld [vmem:[#allocation1 + $0x9] sm:$0xff]  ;;  %v394_v55 = vpop.permute.xlu1 %393 }
 0x124   :  { %625 = vst [vmem:[#allocation1] ss:$4 sm:$0xff] %v1109_v2  ;;  %v399_v58 = vsel %vm397_vm0, %v394_v55, %v396_v6  ;;  %v398_v8 = vsel %vm397_vm0, %v392_v43, %v394_v55  ;;  %vm703_vm0 = vcmask 629760  }
 0x125   :  { %v403_v59 = vsel %vm90_vm10, %v399_v58, 0.0  ;;  %v402_v42 = vsel %vm89_vm11, %v398_v8, 0.0 }
 0x126   :  { %v418_v15 = vmul.f32 %v1223_v12, %v403_v59  ;;  %v417_v10 = vmul.f32 %v1221_v11, %v402_v42 }
 0x128   :  { %v420_v34 = vadd.f32 %v418_v15, %v386_v53  ;;  %v419_v29 = vadd.f32 %v417_v10, %v385_v54  ;;  %v996_v10 = vld [vmem:[%s1563_s2 + $0x63] ss:$8 sm:$0x3] }
 0x12b   :  { %v627_v38 = vld.sshfl [vmem:[#allocation1 + $0x8] sm:$0xff pattern:$0x73625140]  ;;  %v628_v39 = vld.sshfl [vmem:[#allocation1 + $0x10] sm:$0xff pattern:$0x73625140] }
 0x12c   :  { %631 = vrot.lane.b32.xlu1 %v627_v38, %s1073_s12  ;;  %v626_v44 = vld.sshfl [vmem:[#allocation1] sm:$0xff pattern:$0x73625140]  ;;  %633 = vrot.lane.b32.xlu2 %v628_v39, %s1073_s12  ;;  %v464_v45 = vpop.permute.xlu2 %463 }
 0x12d   :  { %629 = vrot.lane.b32.xlu0 %v626_v44, %s1073_s12  ;;  %648 = vst [vmem:[#allocation1] ss:$9 sm:$0xff] %v989_v21 }
 0x12e   :  { %650 = vst [vmem:[#allocation1 + $0x1] ss:$9 sm:$0xff] %v990_v49 }
 0x132   :  { %v428_v24 = vpop.permute.xlu1 %427 }
 0x133   :  { %v433_v12 = vsel %vm431_vm1, %v428_v24, %v430_v28  ;;  %v426_v50 = vpop.permute.xlu0 %425 }
 0x134   :  { %v437_v13 = vsel %vm58_vm6, %v433_v12, 0.0  ;;  %v432_v21 = vsel %vm431_vm1, %v426_v50, %v428_v24  ;;  %vm669_vm1 = vcmask 637952  }
 0x135   :  { %v1371_v7 = vld [vmem:[#allocation1] sm:$0xff]  ;;  %v1373_v14 = vld [vmem:[#allocation1 + $0x9] sm:$0xff]  ;;  %v452_v11 = vmul.f32 %v1234_v23, %v437_v13  ;;  %v436_v49 = vsel %vm57_vm3, %v432_v21, 0.0 }
 0x136   :  { %659 = vst [vmem:[#allocation1] ss:$4 sm:$0xff] %v1109_v2  ;;  %v451_v39 = vmul.f32 %v1232_v20, %v436_v49  ;;  %v993_v23 = vld [vmem:[%s1563_s2 + $0x22] ss:$8 sm:$0x3] }
 0x137   :  { %v454_v5 = vadd.f32 %v452_v11, %v420_v34  ;;  %v994_v20 = vld [vmem:[%s1563_s2 + $0x62] ss:$8 sm:$0x3] }
 0x138   :  { %v453_v44 = vadd.f32 %v451_v39, %v419_v29 }
 0x13d   :  { %v661_v60 = vld.sshfl [vmem:[#allocation1 + $0x8] sm:$0xff pattern:$0x73625140]  ;;  %v662_v1 = vld.sshfl [vmem:[#allocation1 + $0x10] sm:$0xff pattern:$0x73625140] }
 0x13e   :  { %665 = vrot.lane.b32.xlu1 %v661_v60, %s1074_s17  ;;  %v660_v33 = vld.sshfl [vmem:[#allocation1] sm:$0xff pattern:$0x73625140]  ;;  %667 = vrot.lane.b32.xlu2 %v662_v1, %s1074_s17  ;;  %v498_v58 = vpop.permute.xlu2 %497 }
 0x13f   :  { %663 = vrot.lane.b32.xlu0 %v660_v33, %s1074_s17  ;;  %682 = vst [vmem:[#allocation1] ss:$9 sm:$0xff] %v991_v0  ;;  %v995_v1 = vld [vmem:[%s1563_s2 + $0x23] ss:$8 sm:$0x3] }
 0x140   :  { %684 = vst [vmem:[#allocation1 + $0x1] ss:$9 sm:$0xff] %v992_v63 }
 0x144   :  { %v462_v57 = vpop.permute.xlu1 %461 }
 0x145   :  { %v467_v46 = vsel %vm465_vm2, %v462_v57, %v464_v45  ;;  %v460_v47 = vpop.permute.xlu0 %459  ;;  %v997_v45 = vld [vmem:[%s1563_s2 + $0x24] ss:$8 sm:$0x3] }
 0x146   :  { %v471_v48 = vsel %vm66_vm7, %v467_v46, 0.0  ;;  %v466_v35 = vsel %vm465_vm2, %v460_v47, %v462_v57  ;;  %v998_v57 = vld [vmem:[%s1563_s2 + $0x64] ss:$8 sm:$0x3]  ;;  %vm737_vm2 = vcmask 621568  }
 0x147   :  { %v1394_v37 = vld [vmem:[#allocation1] sm:$0xff]  ;;  %v1396_v38 = vld [vmem:[#allocation1 + $0x9] sm:$0xff]  ;;  %v486_v56 = vmul.f32 %v1245_v32, %v471_v48  ;;  %v470_v36 = vsel %vm65_vm4, %v466_v35, 0.0 }
 0x148   :  { %693 = vst [vmem:[#allocation1] ss:$4 sm:$0xff] %v1109_v2  ;;  %v485_v53 = vmul.f32 %v1243_v31, %v470_v36  ;;  %v999_v48 = vld [vmem:[%s1563_s2 + $0x25] ss:$8 sm:$0x3] }
 0x149   :  { %v488_v6 = vadd.f32 %v486_v56, %v454_v5  ;;  %v1000_v35 = vld [vmem:[%s1563_s2 + $0x65] ss:$8 sm:$0x3] }
 0x14a   :  { %v487_v55 = vadd.f32 %v485_v53, %v453_v44  ;;  %v1001_v53 = vld [vmem:[%s1563_s2 + $0x26] ss:$8 sm:$0x3] }
 0x14f   :  { %v695_v51 = vld.sshfl [vmem:[#allocation1 + $0x8] sm:$0xff pattern:$0x73625140]  ;;  %v696_v52 = vld.sshfl [vmem:[#allocation1 + $0x10] sm:$0xff pattern:$0x73625140] }
 0x150   :  { %699 = vrot.lane.b32.xlu1 %v695_v51, %s1075_s20  ;;  %v694_v54 = vld.sshfl [vmem:[#allocation1] sm:$0xff pattern:$0x73625140]  ;;  %701 = vrot.lane.b32.xlu2 %v696_v52, %s1075_s20 }
 0x151   :  { %697 = vrot.lane.b32.xlu0 %v694_v54, %s1075_s20  ;;  %716 = vst [vmem:[#allocation1] ss:$9 sm:$0xff] %v993_v23  ;;  %v1002_v54 = vld [vmem:[%s1563_s2 + $0x66] ss:$8 sm:$0x3] }
 0x152   :  { %718 = vst [vmem:[#allocation1 + $0x1] ss:$9 sm:$0xff] %v994_v20 }
 0x156   :  { %v496_v43 = vpop.permute.xlu1 %495 }
 0x157   :  { %v501_v32 = vsel %vm499_vm9, %v496_v43, %v498_v58  ;;  %v494_v0 = vpop.permute.xlu0 %493 }
 0x158   :  { %v520_v59 = vmul.f32 %v1256_v41, %v501_v32  ;;  %v500_v8 = vsel %vm499_vm9, %v494_v0, %v496_v43  ;;  %v1003_v0 = vld [vmem:[%s1563_s2 + $0x27] ss:$8 sm:$0x3]  ;;  %vm771_vm9 = vcmask 523264  }
 0x159   :  { %v1413_v63 = vld [vmem:[#allocation1] sm:$0xff]  ;;  %v1415_v31 = vld [vmem:[#allocation1 + $0x9] sm:$0xff]  ;;  %v519_v15 = vmul.f32 %v1254_v40, %v500_v8  ;;  %v532_v40 = vpop.permute.xlu2 %531 }
 0x15a   :  { %727 = vst [vmem:[#allocation1] ss:$4 sm:$0xff] %v1109_v2  ;;  %v522_v42 = vadd.f32 %v520_v59, %v488_v6  ;;  %v1004_v59 = vld [vmem:[%s1563_s2 + $0x67] ss:$8 sm:$0x3] }
 0x15b   :  { %v521_v60 = vadd.f32 %v519_v15, %v487_v55 }
 0x161   :  { %v730_v41 = vld.sshfl [vmem:[#allocation1 + $0x10] sm:$0xff pattern:$0x73625140]  ;;  %v728_v33 = vld.sshfl [vmem:[#allocation1] sm:$0xff pattern:$0x73625140] }
 0x162   :  { %735 = vrot.lane.b32.xlu1 %v730_v41, %s1076_s25  ;;  %v729_v34 = vld.sshfl [vmem:[#allocation1 + $0x8] sm:$0xff pattern:$0x73625140]  ;;  %731 = vrot.lane.b32.xlu2 %v728_v33, %s1076_s25 }
 0x163   :  { %733 = vrot.lane.b32.xlu0 %v729_v34, %s1076_s25  ;;  %750 = vst [vmem:[#allocation1] ss:$9 sm:$0xff] %v995_v1  ;;  %v566_v34 = vpop.permute.xlu2 %565  ;;  %s945_s25 = sshll.u32 %s1564_s3, 4  ;;  %s946_s25 = int_to_ptr.hbm [resolvable:$true] %s945_s25 }
 0x164   :  { %752 = vst [vmem:[#allocation1 + $0x1] ss:$9 sm:$0xff] %v996_v10 }
 0x168   :  { %v530_v29 = vpop.permute.xlu1 %529 }
 0x169   :  { %v535_v28 = vsel %vm533_vm12, %v530_v29, %v532_v40  ;;  %v528_v24 = vpop.permute.xlu0 %527 }
 0x16a   :  { %v539_v12 = vsel %vm82_vm8, %v535_v28, 0.0  ;;  %v534_v50 = vsel %vm533_vm12, %v528_v24, %v530_v29  ;;  %vm805_vm12 = vcmask 515072  }
 0x16b   :  { %v1427_v13 = vld [vmem:[#allocation1] sm:$0xff]  ;;  %v1429_v21 = vld [vmem:[#allocation1 + $0x9] sm:$0xff]  ;;  %v554_v11 = vmul.f32 %v1267_v9, %v539_v12  ;;  %v538_v49 = vsel %vm81_vm5, %v534_v50, 0.0 }
 0x16c   :  { %761 = vst [vmem:[#allocation1] ss:$4 sm:$0xff] %v1109_v2  ;;  %v553_v39 = vmul.f32 %v1265_v4, %v538_v49 }
 0x16d   :  { %v1436_v5 = vadd.f32 %v554_v11, %v522_v42 }
 0x16e   :  { %v1438_v44 = vadd.f32 %v553_v39, %v521_v60 }
 0x173   :  { %v764_v9 = vld.sshfl [vmem:[#allocation1 + $0x10] sm:$0xff pattern:$0x73625140]  ;;  %v762_v46 = vld.sshfl [vmem:[#allocation1] sm:$0xff pattern:$0x73625140] }
 0x174   :  { %769 = vrot.lane.b32.xlu1 %v764_v9, %s1077_s30  ;;  %v763_v47 = vld.sshfl [vmem:[#allocation1 + $0x8] sm:$0xff pattern:$0x73625140]  ;;  %765 = vrot.lane.b32.xlu2 %v762_v46, %s1077_s30  ;;  %v600_v28 = vpop.permute.xlu2 %599 }
 0x175   :  { %767 = vrot.lane.b32.xlu0 %v763_v47, %s1077_s30  ;;  %784 = vst [vmem:[#allocation1] ss:$9 sm:$0xff] %v997_v45 }
 0x176   :  { %786 = vst [vmem:[#allocation1 + $0x1] ss:$9 sm:$0xff] %v998_v57 }
 0x17a   :  { %v564_v40 = vpop.permute.xlu1 %563 }
 0x17b   :  { %v562_v29 = vpop.permute.xlu0 %561 }
 0x17d   :  { %v1446_v4 = vld [vmem:[#allocation1] sm:$0xff]  ;;  %v1448_v23 = vld [vmem:[#allocation1 + $0x9] sm:$0xff] }
 0x17e   :  { %795 = vst [vmem:[#allocation1] ss:$4 sm:$0xff] %v1109_v2 }
 0x185   :  { %v798_v20 = vld.sshfl [vmem:[#allocation1 + $0x10] sm:$0xff pattern:$0x73625140]  ;;  %v796_v56 = vld.sshfl [vmem:[#allocation1] sm:$0xff pattern:$0x73625140] }
 0x186   :  { %803 = vrot.lane.b32.xlu1 %v798_v20, %s1078_s8  ;;  %v797_v36 = vld.sshfl [vmem:[#allocation1 + $0x8] sm:$0xff pattern:$0x73625140]  ;;  %799 = vrot.lane.b32.xlu2 %v796_v56, %s1078_s8  ;;  %v634_v50 = vpop.permute.xlu2 %633  ;;  %v1005_v20 = vld [vmem:[%s1563_s2 + $0x30] ss:$8 sm:$0x3] }
 0x187   :  { %801 = vrot.lane.b32.xlu0 %v797_v36, %s1078_s8  ;;  %818 = vst [vmem:[#allocation1] ss:$9 sm:$0xff] %v999_v48  ;;  %v1006_v56 = vld [vmem:[%s1563_s2 + $0x70] ss:$8 sm:$0x3]  ;;  %s1082_s2 = smov [#allocation2]  }
 0x188   :  { %820 = vst [vmem:[#allocation1 + $0x1] ss:$9 sm:$0xff] %v1000_v35  ;;  %s943_s22 = sshll.u32 %s1082_s2, 4  ;;  %s944_s22 = int_to_ptr.vmem [resolvable:$true] %s943_s22 }
 0x18c   :  { %v598_v24 = vpop.permute.xlu1 %597 }
 0x18d   :  { %v596_v12 = vpop.permute.xlu0 %595 }
 0x18f   :  { %v1457_v51 = vld [vmem:[#allocation1] sm:$0xff]  ;;  %v1459_v52 = vld [vmem:[#allocation1 + $0x9] sm:$0xff] }
 0x190   :  { %829 = vst [vmem:[#allocation1] ss:$4 sm:$0xff] %v1109_v2 }
 0x197   :  { %v832_v6 = vld.sshfl [vmem:[#allocation1 + $0x10] sm:$0xff pattern:$0x73625140]  ;;  %v831_v55 = vld.sshfl [vmem:[#allocation1 + $0x8] sm:$0xff pattern:$0x73625140] }
 0x198   :  { %837 = vrot.lane.b32.xlu1 %v832_v6, %s1079_s13  ;;  %835 = vrot.lane.b32.xlu0 %v831_v55, %s1079_s13  ;;  %v830_v58 = vld.sshfl [vmem:[#allocation1] sm:$0xff pattern:$0x73625140]  ;;  %v668_v39 = vpop.permute.xlu2 %667  ;;  %v569_v6 = vsel %vm567_vm13, %v564_v40, %v566_v34 }
 0x199   :  { %852 = vst [vmem:[#allocation1] ss:$9 sm:$0xff] %v1001_v53 }
 0x19a   :  { %854 = vst [vmem:[#allocation1 + $0x1] ss:$9 sm:$0xff] %v1002_v54 }
 0x19e   :  { %v632_v11 = vpop.permute.xlu1 %631 }
 0x19f   :  { %v630_v49 = vpop.permute.xlu0 %629 }
 0x1a0   :  { %833 = vrot.lane.b32.xlu1 %v830_v58, %s1079_s13 }
 0x1a1   :  { %v1468_v43 = vld [vmem:[#allocation1] sm:$0xff]  ;;  %v1470_v32 = vld [vmem:[#allocation1 + $0x9] sm:$0xff] }
 0x1a2   :  { %863 = vst [vmem:[#allocation1] ss:$4 sm:$0xff] %v1109_v2 }
 0x1a9   :  { %v866_v8 = vld.sshfl [vmem:[#allocation1 + $0x10] sm:$0xff pattern:$0x73625140]  ;;  %v864_v15 = vld.sshfl [vmem:[#allocation1] sm:$0xff pattern:$0x73625140] }
 0x1aa   :  { %871 = vrot.lane.b32.xlu0 %v866_v8, %s1080_s18  ;;  %v865_v42 = vld.sshfl [vmem:[#allocation1 + $0x8] sm:$0xff pattern:$0x73625140]  ;;  %v573_v8 = vsel %vm90_vm10, %v569_v6, 0.0 }
 0x1ab   :  { %869 = vrot.lane.b32.xlu2 %v865_v42, %s1080_s18  ;;  %886 = vst [vmem:[#allocation1] ss:$9 sm:$0xff] %v1003_v0  ;;  %v568_v0 = vsel %vm567_vm13, %v562_v29, %v564_v40  ;;  %vm839_vm13 = vcmask 506880  }
 0x1ac   :  { %888 = vst [vmem:[#allocation1 + $0x1] ss:$9 sm:$0xff] %v1004_v59  ;;  %v572_v42 = vsel %vm89_vm11, %v568_v0, 0.0 }
 0x1ad   :  { %v587_v40 = vmul.f32 %v1328_v25, %v572_v42 }
 0x1b0   :  { %v666_v45 = vpop.permute.xlu1 %665 }
 0x1b1   :  { %v664_v57 = vpop.permute.xlu0 %663  ;;  %v671_v6 = vsel %vm669_vm1, %v666_v45, %v668_v39 }
 0x1b2   :  { %v670_v42 = vsel %vm669_vm1, %v664_v57, %v666_v45  ;;  %v690_v39 = vmul.f32 %v1396_v38, %v671_v6 }
 0x1b3   :  { %v1479_v60 = vld [vmem:[#allocation1] sm:$0xff]  ;;  %v1481_v1 = vld [vmem:[#allocation1 + $0x9] sm:$0xff]  ;;  %867 = vrot.lane.b32.xlu2 %v864_v15, %s1080_s18  ;;  %v603_v15 = vsel %vm601_vm14, %v598_v24, %v600_v28  ;;  %v689_v45 = vmul.f32 %v1394_v37, %v670_v42 }
 0x1b4   :  { %897 = vst [vmem:[#allocation1] ss:$4 sm:$0xff] %v1109_v2  ;;  %v702_v2 = vpop.permute.xlu2 %701  ;;  %v607_v34 = vsel %vm58_vm6, %v603_v15, 0.0 }
 0x1bb   :  { %v900_v10 = vld.sshfl [vmem:[#allocation1 + $0x10] sm:$0xff pattern:$0x73625140]  ;;  %v899_v41 = vld.sshfl [vmem:[#allocation1 + $0x8] sm:$0xff pattern:$0x73625140] }
 0x1bc   :  { %905 = vrot.lane.b32.xlu1 %v900_v10, %s1081_s19  ;;  %903 = vrot.lane.b32.xlu0 %v899_v41, %s1081_s19  ;;  %v898_v33 = vld.sshfl [vmem:[#allocation1] sm:$0xff pattern:$0x73625140]  ;;  %v732_v47 = vpop.permute.xlu2 %731  ;;  %v602_v10 = vsel %vm601_vm14, %v596_v12, %v598_v24  ;;  %v588_v41 = vmul.f32 %v1330_v16, %v573_v8  ;;  %v622_v12 = vmul.f32 %v1354_v62, %v607_v34 }
 0x1bd   :  { %901 = vrot.lane.b32.xlu2 %v898_v33, %s1081_s19  ;;  %920 = vst [vmem:[#allocation1] ss:$9 sm:$0xff] %v1005_v20  ;;  %v637_v33 = vsel %vm635_vm15, %v632_v11, %v634_v50  ;;  %v636_v20 = vsel %vm635_vm15, %v630_v49, %v632_v11  ;;  %v606_v29 = vsel %vm57_vm3, %v602_v10, 0.0  ;;  %v589_v8 = vadd.f32 %v587_v40, %v1438_v44 }
 0x1be   :  { %922 = vst [vmem:[#allocation1 + $0x1] ss:$9 sm:$0xff] %v1006_v56  ;;  %v641_v28 = vsel %vm66_vm7, %v637_v33, 0.0  ;;  %v590_v16 = vadd.f32 %v588_v41, %v1436_v5  ;;  %v640_v50 = vsel %vm65_vm4, %v636_v20, 0.0  ;;  %v621_v25 = vmul.f32 %v1352_v61, %v606_v29 }
 0x1bf   :  { %v656_v15 = vmul.f32 %v1373_v14, %v641_v28  ;;  %v655_v62 = vmul.f32 %v1371_v7, %v640_v50 }
 0x1c0   :  { %v624_v61 = vadd.f32 %v622_v12, %v590_v16 }
 0x1c2   :  { %v700_v9 = vpop.permute.xlu1 %699 }
 0x1c3   :  { %v698_v46 = vpop.permute.xlu0 %697  ;;  %v705_v11 = vsel %vm703_vm0, %v700_v9, %v702_v2 }
 0x1c4   :  { %v704_v0 = vsel %vm703_vm0, %v698_v46, %v700_v9  ;;  %v709_v2 = vsel %vm82_vm8, %v705_v11, 0.0  ;;  %v623_v9 = vadd.f32 %v621_v25, %v589_v8  ;;  %v658_v46 = vadd.f32 %v656_v15, %v624_v61 }
 0x1c5   :  { %v708_v44 = vsel %vm81_vm5, %v704_v0, 0.0  ;;  %v924_v42 = vld [vmem:[#allocation1 + $0x9] sm:$0xff] }
 0x1c6   :  { %v723_v41 = vmul.f32 %v1413_v63, %v708_v44  ;;  %v692_v33 = vadd.f32 %v690_v39, %v658_v46 }
 0x1ce   :  { %v766_v36 = vpop.permute.xlu2 %765 }
 0x1d4   :  { %v736_v48 = vpop.permute.xlu1 %735 }
 0x1d5   :  { %v734_v35 = vpop.permute.xlu0 %733 }
 0x1d6   :  { %v739_v5 = vsel %vm737_vm2, %v734_v35, %v736_v48  ;;  %v738_v10 = vsel %vm737_vm2, %v732_v47, %v734_v35  ;;  %v724_v47 = vmul.f32 %v1415_v31, %v709_v2  ;;  %v657_v35 = vadd.f32 %v655_v62, %v623_v9 }
 0x1d7   :  { %v743_v7 = vsel %vm90_vm10, %v739_v5, 0.0  ;;  %v742_v48 = vsel %vm89_vm11, %v738_v10, 0.0 }
 0x1d8   :  { %v758_v34 = vmul.f32 %v1429_v21, %v743_v7  ;;  %v691_v20 = vadd.f32 %v689_v45, %v657_v35  ;;  %v726_v26 = vadd.f32 %v724_v47, %v692_v33 }
 0x1da   :  { %v725_v21 = vadd.f32 %v723_v41, %v691_v20  ;;  %v760_v16 = vadd.f32 %v758_v34, %v726_v26 }
 0x1e0   :  { %v800_v55 = vpop.permute.xlu2 %799 }
 0x1e6   :  { %v770_v53 = vpop.permute.xlu1 %769 }
 0x1e7   :  { %v768_v54 = vpop.permute.xlu0 %767 }
 0x1e8   :  { %v773_v14 = vsel %vm771_vm9, %v768_v54, %v770_v53  ;;  %v772_v57 = vsel %vm771_vm9, %v766_v36, %v768_v54 }
 0x1e9   :  { %v777_v53 = vsel %vm58_vm6, %v773_v14, 0.0  ;;  %v776_v36 = vsel %vm57_vm3, %v772_v57, 0.0  ;;  %vm873_vm6 = vcmask 498688   ;;  %vm907_vm3 = vcmask 490496  }
 0x1ea   :  { %v792_v29 = vmul.f32 %v1448_v23, %v777_v53  ;;  %v791_v17 = vmul.f32 %v1446_v4, %v776_v36 }
 0x1ec   :  { %v794_v23 = vadd.f32 %v792_v29, %v760_v16 }
 0x1f8   :  { %v804_v58 = vpop.permute.xlu1 %803 }
 0x1f9   :  { %v802_v59 = vpop.permute.xlu0 %801 }
 0x1fa   :  { %v807_v38 = vsel %vm805_vm12, %v802_v59, %v804_v58  ;;  %v806_v37 = vsel %vm805_vm12, %v800_v55, %v802_v59  ;;  %v757_v58 = vmul.f32 %v1427_v13, %v742_v48 }
 0x1fb   :  { %v811_v63 = vsel %vm66_vm7, %v807_v38, 0.0  ;;  %v810_v55 = vsel %vm65_vm4, %v806_v37, 0.0  ;;  %vm934_vm4 = vcmask 1041408  }
 0x1fc   :  { %v826_v13 = vmul.f32 %v1459_v52, %v811_v63  ;;  %v759_v12 = vadd.f32 %v757_v58, %v725_v21  ;;  %v825_v50 = vmul.f32 %v1457_v51, %v810_v55 }
 0x1fe   :  { %v793_v6 = vadd.f32 %v791_v17, %v759_v12 }
 0x205   :  { %v870_v56 = vpop.permute.xlu2 %869 }
 0x20a   :  { %v838_v24 = vpop.permute.xlu1 %837  ;;  %v836_v49 = vpop.permute.xlu0 %835 }
 0x20b   :  { %v841_v59 = vsel %vm839_vm13, %v836_v49, %v838_v24  ;;  %v828_v24 = vadd.f32 %v826_v13, %v794_v23 }
 0x20c   :  { %v860_v18 = vmul.f32 %v1470_v32, %v841_v59  ;;  %v923_v32 = vld [vmem:[#allocation1] sm:$0xff] }
 0x20d   :  { %v868_v31 = vpop.permute.xlu2 %867 }
 0x20e   :  { %v874_v11 = vsel %vm873_vm6, %v868_v31, %v870_v56  ;;  %v862_v51 = vadd.f32 %v860_v18, %v828_v24 }
 0x20f   :  { %v878_v0 = vsel %vm81_vm5, %v874_v11, 0.0 }
 0x210   :  { %v893_v22 = vmul.f32 %v1479_v60, %v878_v0 }
 0x212   :  { %v834_v40 = vpop.permute.xlu1 %833 }
 0x213   :  { %v840_v27 = vsel %vm839_vm13, %v834_v40, %v836_v49  ;;  %v827_v49 = vadd.f32 %v825_v50, %v793_v6 }
 0x214   :  { %v859_v4 = vmul.f32 %v1468_v43, %v840_v27 }
 0x216   :  { %v861_v5 = vadd.f32 %v859_v4, %v827_v49 }
 0x217   :  { %v902_v52 = vpop.permute.xlu2 %901 }
 0x21c   :  { %v872_v54 = vpop.permute.xlu0 %871 }
 0x21d   :  { %v875_v28 = vsel %vm873_vm6, %v870_v56, %v872_v54 }
 0x21e   :  { %v879_v25 = vsel %vm82_vm8, %v875_v28, 0.0 }
 0x21f   :  { %v894_v8 = vmul.f32 %v1481_v1, %v879_v25  ;;  %v895_v1 = vadd.f32 %v893_v22, %v861_v5 }
 0x221   :  { %v896_v10 = vadd.f32 %v894_v8, %v862_v51 }
 0x22e   :  { %v906_v56 = vpop.permute.xlu1 %905  ;;  %v904_v15 = vpop.permute.xlu0 %903 }
 0x22f   :  { %v909_v62 = vsel %vm907_vm3, %v904_v15, %v906_v56  ;;  %v908_v2 = vsel %vm907_vm3, %v902_v52, %v904_v15 }
 0x230   :  { %v913_v43 = vsel %vm90_vm10, %v909_v62, 0.0  ;;  %v912_v19 = vsel %vm89_vm11, %v908_v2, 0.0 }
 0x231   :  { %v928_v61 = vmul.f32 %v924_v42, %v913_v43  ;;  %v927_v39 = vmul.f32 %v923_v32, %v912_v19 }
 0x233   :  { %v930_v44 = vadd.f32 %v928_v61, %v896_v10  ;;  %v929_v14 = vadd.f32 %v927_v39, %v895_v1 }
 0x235   :  { %v933_v60 = vrot.slane %v930_v44, 6 }
 0x237   :  { %v935_v3 = vsel %vm934_vm4, %v929_v14, %v933_v60 }
 0x238   :  { %937 = vst [vmem:[#allocation2] sm:$0xf] %v935_v3 }
 0x239   :  { %948 = dma.vmem_to_hbm [thread:$0]  %s944_s22, 64, %s946_s25, [#allocation3]  }
 0x23a   :  { %1056 = dma.done.wait [#allocation3], 64  }
 0x23b   :  { %1057 = vsyncadd [#allocation3], 4294967232 }
 0x23c   :  { %953 = vsyncpa [#allocation3], 1 }

</bundles_post_ra>
